<compile_context>
chip_gen: v5e
topology: v5e:2x2
jax: 0.10.0
libtpu: 0.0.40
codegen_flags: <defaults>
</compile_context>

<pallas_src>
import functools
import math

import jax
import jax.numpy as jnp
from jax import lax
from jax.experimental import pallas as pl
from jax.experimental.pallas import tpu as pltpu

LN_EPS = 1e-5  # nn.LayerNorm default eps


def _tcn_stack_kernel(x_ref, w1_ref, dw_ref, ws_ref, hp_ref, o_ref, *,
                      num_layers, kernel_size, n_ch):
    # x_ref block: (1, Bc, T) -> (Bc, T); channels on sublanes, time on lanes.
    x = x_ref[0].astype(jnp.float32)
    T = x.shape[-1]
    lane = lax.broadcasted_iota(jnp.int32, (1, T), 1)  # hoisted, reused by taps

    for layer in range(num_layers):  # static unroll: activation stays resident
        dilation = 2 ** layer
        pad = dilation * (kernel_size - 1) // 2

        w1 = w1_ref[layer]                      # (H, Bc)  conv1x1 weight
        dw = dw_ref[layer]                      # (H, P)   depthwise weight
        ws = ws_ref[layer]                      # (Bc, H)  sconv weight
        hp = hp_ref[layer]                      # (H, 8)   packed small params
        b1, g1, be1 = hp[:, 0:1], hp[:, 1:2], hp[:, 2:3]
        db, g2, be2 = hp[:, 3:4], hp[:, 4:5], hp[:, 5:6]
        bs = hp[0:n_ch, 6:7]                    # sconv bias (Bc, 1)
        a1 = hp[0:1, 7:8]                       # PReLU alphas (scalar, (1,1))
        a2 = hp[1:2, 7:8]

        # --- conv1x1: (H, Bc) @ (Bc, T) + bias -------------------------------
        y = jnp.dot(w1, x, preferred_element_type=jnp.float32) + b1

        # --- PReLU 1 ---------------------------------------------------------
        y = jnp.where(y >= 0, y, a1 * y)

        # --- ChannelWiseLayerNorm 1 (over channel axis, per time step) -------
        mean = jnp.mean(y, axis=0, keepdims=True)
        var = jnp.mean((y - mean) ** 2, axis=0, keepdims=True)
        y = (y - mean) * lax.rsqrt(var + LN_EPS) * g1 + be1

        # --- dilated depthwise conv, 'same' padding, via roll + mask ---------
        acc = jnp.zeros_like(y)
        for k in range(kernel_size):            # static unroll over taps
            s = k * dilation - pad              # tap[:, t] = y[:, t + s]
            if s == 0:
                tap = y
            else:
                rolled = pltpu.roll(y, shift=(-s) % T, axis=1)
                valid = jnp.logical_and(lane + s >= 0, lane + s < T)
                tap = jnp.where(valid, rolled, 0.0)
            acc = acc + dw[:, k:k + 1] * tap
        y = acc + db

        # --- PReLU 2 ---------------------------------------------------------
        y = jnp.where(y >= 0, y, a2 * y)

        # --- ChannelWiseLayerNorm 2 -------------------------------------------
        mean = jnp.mean(y, axis=0, keepdims=True)
        var = jnp.mean((y - mean) ** 2, axis=0, keepdims=True)
        y = (y - mean) * lax.rsqrt(var + LN_EPS) * g2 + be2

        # --- sconv 1x1 back to Bc channels + residual --------------------------
        x = x + jnp.dot(ws, y, preferred_element_type=jnp.float32) + bs

    o_ref[0] = x.astype(o_ref.dtype)


def _pack_params(block_params):
    """Stack per-layer weights; pack all small per-channel params into (X,H,8)."""
    H, Bc = block_params[0]["w1"].shape
    assert Bc <= H, "parameter packing assumes B <= H (true for ConvTasNet)"
    w1s = jnp.stack([p["w1"] for p in block_params])          # (X, H, Bc)
    dws = jnp.stack([p["dw"] for p in block_params])          # (X, H, P)
    wss = jnp.stack([p["ws"] for p in block_params])          # (X, Bc, H)
    hps = []
    for p in block_params:
        hp = jnp.zeros((H, 8), jnp.float32)
        hp = hp.at[:, 0].set(p["b1"][:, 0])
        hp = hp.at[:, 1].set(p["g1"][:, 0])
        hp = hp.at[:, 2].set(p["be1"][:, 0])
        hp = hp.at[:, 3].set(p["db"][:, 0])
        hp = hp.at[:, 4].set(p["g2"][:, 0])
        hp = hp.at[:, 5].set(p["be2"][:, 0])
        hp = hp.at[:Bc, 6].set(p["bs"][:, 0])
        hp = hp.at[0, 7].set(p["a1"][0, 0])
        hp = hp.at[1, 7].set(p["a2"][0, 0])
        hps.append(hp)
    return w1s, dws, wss, jnp.stack(hps)                       # hps: (X, H, 8)


def tcn_block_forward(x, block_params, *, kernel_size):
    """TCN_block.forward: X Conv1DBlocks (dilation 2**i), fused in one kernel."""
    N, Bc, T = x.shape
    X = len(block_params)
    H = block_params[0]["w1"].shape[0]
    P = kernel_size
    assert kernel_size % 2 == 1, "non-causal 'same' padding assumes odd kernel_size"
    assert (2 ** (X - 1)) * (kernel_size - 1) // 2 < T, "dilation too large for T"

    w1s, dws, wss, hps = _pack_params(block_params)

    def full(shape):
        nd = len(shape)
        return pl.BlockSpec(shape, lambda n, _nd=nd: (0,) * _nd)

    kernel = functools.partial(_tcn_stack_kernel, num_layers=X,
                               kernel_size=kernel_size, n_ch=Bc)
    return pl.pallas_call(
        kernel,
        out_shape=jax.ShapeDtypeStruct((N, Bc, T), x.dtype),
        grid=(N,),
        in_specs=[
            pl.BlockSpec((1, Bc, T), lambda n: (n, 0, 0)),     # activation
            full((X, H, Bc)),                                  # conv1x1 weights
            full((X, H, P)),                                   # dconv weights
            full((X, Bc, H)),                                  # sconv weights
            full((X, H, 8)),                                   # packed small params
        ],
        out_specs=pl.BlockSpec((1, Bc, T), lambda n: (n, 0, 0)),
        compiler_params=pltpu.CompilerParams(
            dimension_semantics=("parallel",),
            vmem_limit_bytes=32 * 1024 * 1024),
    )(x, w1s, dws, wss, hps)


def init_tcn_params(key, X, P, B, H):
    params = []
    for _ in range(X):
        key, k_w1, k_b1, k_dw, k_db, k_ws = jax.random.split(key, 6)
        params.append({
            "w1": jax.random.normal(k_w1, (H, B), jnp.float32) / math.sqrt(B),
            "b1": jax.random.normal(k_b1, (H, 1), jnp.float32) * 0.01,
            "a1": jnp.full((1, 1), 0.25, jnp.float32),      # nn.PReLU default
            "g1": jnp.ones((H, 1), jnp.float32),            # LayerNorm weight
            "be1": jnp.zeros((H, 1), jnp.float32),          # LayerNorm bias
            "dw": jax.random.normal(k_dw, (H, P), jnp.float32) / math.sqrt(P),
            "db": jax.random.normal(k_db, (H, 1), jnp.float32) * 0.01,
            "a2": jnp.full((1, 1), 0.25, jnp.float32),
            "g2": jnp.ones((H, 1), jnp.float32),
            "be2": jnp.zeros((H, 1), jnp.float32),
            "ws": jax.random.normal(k_ws, (B, H), jnp.float32) / math.sqrt(H),
            "bs": jnp.zeros((B, 1), jnp.float32),
        })
    return params


# ------------------------ pure-JAX reference (for checking) ------------------
def _ref_block(x, p, dilation, kernel_size):
    def one(xb):  # xb: (B, T)
        y = p["w1"] @ xb + p["b1"]
        y = jnp.where(y >= 0, y, p["a1"] * y)
        m = jnp.mean(y, axis=0, keepdims=True)
        v = jnp.mean((y - m) ** 2, axis=0, keepdims=True)
        y = (y - m) / jnp.sqrt(v + LN_EPS) * p["g1"] + p["be1"]
        H, T = y.shape
        pad = dilation * (kernel_size - 1) // 2
        yp = jnp.pad(y, ((0, 0), (pad, pad)))
        acc = jnp.zeros_like(y)
        for k in range(kernel_size):
            acc = acc + p["dw"][:, k:k + 1] * yp[:, k * dilation:k * dilation + T]
        y = acc + p["db"]
        y = jnp.where(y >= 0, y, p["a2"] * y)
        m = jnp.mean(y, axis=0, keepdims=True)
        v = jnp.mean((y - m) ** 2, axis=0, keepdims=True)
        y = (y - m) / jnp.sqrt(v + LN_EPS) * p["g2"] + p["be2"]
        return xb + (p["ws"] @ y + p["bs"])
    return jax.vmap(one)(x)


def _ref_forward(x, block_params, kernel_size):
    for i, p in enumerate(block_params):
        x = _ref_block(x, p, 2 ** i, kernel_size)
    return x


if __name__ == "__main__":
    # TCN_block(X=3, P=3, B=16, H=32, causal=False); input (N, B, T) = (2, 16, 128)
    X, P, B, H = 3, 3, 16, 32
    N, T = 2, 128   # T=128 keeps the lane axis fully dense

    key = jax.random.PRNGKey(0)
    key, kx = jax.random.split(key)
    x = jax.random.normal(kx, (N, B, T), jnp.float32)
    params = init_tcn_params(key, X, P, B, H)

    out = tcn_block_forward(x, params, kernel_size=P)
    out = jax.block_until_ready(out)

    ref = _ref_forward(x, params, P)
    assert out.shape == (N, B, T) and out.dtype == jnp.float32
    assert jnp.allclose(out, ref, rtol=1e-4, atol=1e-4), "mismatch vs JAX reference"

    print("KERNEL_OK")
</pallas_src>

<mosaic_0001>
module attributes {stable_mosaic.version = 11 : i64} {
  func.func @_tcn_stack_kernel(%arg0: i32, %arg1: memref<1x16x128xf32, #tpu.memory_space<vmem>>, %arg2: memref<3x32x16xf32, #tpu.memory_space<vmem>>, %arg3: memref<3x32x3xf32, #tpu.memory_space<vmem>>, %arg4: memref<3x16x32xf32, #tpu.memory_space<vmem>>, %arg5: memref<3x32x8xf32, #tpu.memory_space<vmem>>, %arg6: memref<1x16x128xf32, #tpu.memory_space<vmem>>) attributes {dimension_semantics = [#tpu.dimension_semantics<parallel>], iteration_bounds = array<i64: 2>, scalar_prefetch = 0 : i64, scratch_operands = 0 : i64, tpu.core_type = #tpu.core_type<tc>, window_params = [{transform_indices = @transform_0, window_bounds = array<i64: 1, 16, 128>}, {pipeline_mode = #tpu.pipeline_mode<synchronous>, transform_indices = @transform_1, window_bounds = array<i64: 3, 32, 16>}, {pipeline_mode = #tpu.pipeline_mode<synchronous>, transform_indices = @transform_2, window_bounds = array<i64: 3, 32, 3>}, {pipeline_mode = #tpu.pipeline_mode<synchronous>, transform_indices = @transform_3, window_bounds = array<i64: 3, 16, 32>}, {pipeline_mode = #tpu.pipeline_mode<synchronous>, transform_indices = @transform_4, window_bounds = array<i64: 3, 32, 8>}, {transform_indices = @transform_5, window_bounds = array<i64: 1, 16, 128>}]} {
    %c0 = arith.constant 0 : index
    %c0_0 = arith.constant 0 : index
    %c0_1 = arith.constant 0 : index
    %0 = vector.load %arg1[%c0, %c0_0, %c0_1] : memref<1x16x128xf32, #tpu.memory_space<vmem>>, vector<1x16x128xf32>
    %1 = vector.shape_cast %0 : vector<1x16x128xf32> to vector<16x128xf32>
    %2 = tpu.iota {dimensions = array<i32: 1>} : vector<1x128xi32>
    %c0_2 = arith.constant 0 : index
    %c0_3 = arith.constant 0 : index
    %c0_4 = arith.constant 0 : index
    %3 = vector.load %arg2[%c0_2, %c0_3, %c0_4] : memref<3x32x16xf32, #tpu.memory_space<vmem>>, vector<1x32x16xf32>
    %4 = vector.shape_cast %3 : vector<1x32x16xf32> to vector<32x16xf32>
    %c0_5 = arith.constant 0 : index
    %c0_6 = arith.constant 0 : index
    %c0_7 = arith.constant 0 : index
    %5 = vector.load %arg3[%c0_5, %c0_6, %c0_7] : memref<3x32x3xf32, #tpu.memory_space<vmem>>, vector<1x32x3xf32>
    %6 = vector.shape_cast %5 : vector<1x32x3xf32> to vector<32x3xf32>
    %c0_8 = arith.constant 0 : index
    %c0_9 = arith.constant 0 : index
    %c0_10 = arith.constant 0 : index
    %7 = vector.load %arg4[%c0_8, %c0_9, %c0_10] : memref<3x16x32xf32, #tpu.memory_space<vmem>>, vector<1x16x32xf32>
    %8 = vector.shape_cast %7 : vector<1x16x32xf32> to vector<16x32xf32>
    %c0_11 = arith.constant 0 : index
    %c0_12 = arith.constant 0 : index
    %c0_13 = arith.constant 0 : index
    %9 = vector.load %arg5[%c0_11, %c0_12, %c0_13] : memref<3x32x8xf32, #tpu.memory_space<vmem>>, vector<1x32x8xf32>
    %10 = vector.shape_cast %9 : vector<1x32x8xf32> to vector<32x8xf32>
    %11 = vector.extract_strided_slice %10 {offsets = [0, 0], sizes = [32, 1], strides = [1, 1]} : vector<32x8xf32> to vector<32x1xf32>
    %12 = vector.extract_strided_slice %10 {offsets = [0, 1], sizes = [32, 1], strides = [1, 1]} : vector<32x8xf32> to vector<32x1xf32>
    %13 = vector.extract_strided_slice %10 {offsets = [0, 2], sizes = [32, 1], strides = [1, 1]} : vector<32x8xf32> to vector<32x1xf32>
    %14 = vector.extract_strided_slice %10 {offsets = [0, 3], sizes = [32, 1], strides = [1, 1]} : vector<32x8xf32> to vector<32x1xf32>
    %15 = vector.extract_strided_slice %10 {offsets = [0, 4], sizes = [32, 1], strides = [1, 1]} : vector<32x8xf32> to vector<32x1xf32>
    %16 = vector.extract_strided_slice %10 {offsets = [0, 5], sizes = [32, 1], strides = [1, 1]} : vector<32x8xf32> to vector<32x1xf32>
    %17 = vector.extract_strided_slice %10 {offsets = [0, 6], sizes = [16, 1], strides = [1, 1]} : vector<32x8xf32> to vector<16x1xf32>
    %18 = vector.extract_strided_slice %10 {offsets = [0, 7], sizes = [1, 1], strides = [1, 1]} : vector<32x8xf32> to vector<1x1xf32>
    %19 = vector.extract_strided_slice %10 {offsets = [1, 7], sizes = [1, 1], strides = [1, 1]} : vector<32x8xf32> to vector<1x1xf32>
    %cst = arith.constant dense<0.000000e+00> : vector<32x128xf32>
    %20 = tpu.matmul %4, %1, %cst {dimension_numbers = #tpu.dot_dimension_numbers<[1], [0], [0], [1], [0, 0, 1, 1], [], []>} : vector<32x16xf32>, vector<16x128xf32>, vector<32x128xf32> -> vector<32x128xf32>
    %21 = vector.broadcast %11 : vector<32x1xf32> to vector<32x128xf32>
    %22 = arith.addf %20, %21 : vector<32x128xf32>
    %cst_14 = arith.constant 0.000000e+00 : f32
    %23 = vector.broadcast %cst_14 : f32 to vector<32x128xf32>
    %24 = arith.cmpf oge, %22, %23 : vector<32x128xf32>
    %25 = vector.broadcast %18 : vector<1x1xf32> to vector<32x128xf32>
    %26 = arith.mulf %25, %22 : vector<32x128xf32>
    %27 = arith.select %24, %22, %26 : vector<32x128xi1>, vector<32x128xf32>
    %cst_15 = arith.constant dense<0.000000e+00> : vector<128xf32>
    %28 = vector.multi_reduction <add>, %27, %cst_15 [0] : vector<32x128xf32> to vector<128xf32>
    %29 = vector.shape_cast %28 : vector<128xf32> to vector<1x128xf32>
    %cst_16 = arith.constant 3.200000e+01 : f32
    %30 = vector.broadcast %cst_16 : f32 to vector<1x128xf32>
    %31 = arith.divf %29, %30 : vector<1x128xf32>
    %32 = vector.broadcast %31 : vector<1x128xf32> to vector<32x128xf32>
    %33 = arith.subf %27, %32 : vector<32x128xf32>
    %34 = arith.mulf %33, %33 : vector<32x128xf32>
    %cst_17 = arith.constant dense<0.000000e+00> : vector<128xf32>
    %35 = vector.multi_reduction <add>, %34, %cst_17 [0] : vector<32x128xf32> to vector<128xf32>
    %36 = vector.shape_cast %35 : vector<128xf32> to vector<1x128xf32>
    %cst_18 = arith.constant 3.200000e+01 : f32
    %37 = vector.broadcast %cst_18 : f32 to vector<1x128xf32>
    %38 = arith.divf %36, %37 : vector<1x128xf32>
    %39 = vector.broadcast %31 : vector<1x128xf32> to vector<32x128xf32>
    %40 = arith.subf %27, %39 : vector<32x128xf32>
    %cst_19 = arith.constant 9.99999974E-6 : f32
    %41 = vector.broadcast %cst_19 : f32 to vector<1x128xf32>
    %42 = arith.addf %38, %41 : vector<1x128xf32>
    %43 = math.rsqrt %42 : vector<1x128xf32>
    %44 = vector.broadcast %43 : vector<1x128xf32> to vector<32x128xf32>
    %45 = arith.mulf %40, %44 : vector<32x128xf32>
    %46 = vector.broadcast %12 : vector<32x1xf32> to vector<32x128xf32>
    %47 = arith.mulf %45, %46 : vector<32x128xf32>
    %48 = vector.broadcast %13 : vector<32x1xf32> to vector<32x128xf32>
    %49 = arith.addf %47, %48 : vector<32x128xf32>
    %cst_20 = arith.constant 0.000000e+00 : f32
    %50 = vector.broadcast %cst_20 : f32 to vector<32x128xf32>
    %c1_i32 = arith.constant 1 : i32
    %51 = tpu.dynamic_rotate %49 by %c1_i32 dim 1 : vector<32x128xf32>, i32 -> vector<32x128xf32>
    %c-1_i32 = arith.constant -1 : i32
    %52 = vector.broadcast %c-1_i32 : i32 to vector<1x128xi32>
    %53 = arith.addi %2, %52 : vector<1x128xi32>
    %c0_i32 = arith.constant 0 : i32
    %54 = vector.broadcast %c0_i32 : i32 to vector<1x128xi32>
    %55 = arith.cmpi sge, %53, %54 : vector<1x128xi32>
    %c-1_i32_21 = arith.constant -1 : i32
    %56 = vector.broadcast %c-1_i32_21 : i32 to vector<1x128xi32>
    %57 = arith.addi %2, %56 : vector<1x128xi32>
    %c128_i32 = arith.constant 128 : i32
    %58 = vector.broadcast %c128_i32 : i32 to vector<1x128xi32>
    %59 = arith.cmpi slt, %57, %58 : vector<1x128xi32>
    %60 = arith.andi %55, %59 : vector<1x128xi1>
    %cst_22 = arith.constant 0.000000e+00 : f32
    %61 = vector.shape_cast %60 : vector<1x128xi1> to vector<1x128xi1>
    %62 = vector.broadcast %61 : vector<1x128xi1> to vector<32x128xi1>
    %63 = vector.broadcast %cst_22 : f32 to vector<32x128xf32>
    %64 = arith.select %62, %51, %63 : vector<32x128xi1>, vector<32x128xf32>
    %65 = vector.extract_strided_slice %6 {offsets = [0, 0], sizes = [32, 1], strides = [1, 1]} : vector<32x3xf32> to vector<32x1xf32>
    %66 = vector.broadcast %65 : vector<32x1xf32> to vector<32x128xf32>
    %67 = arith.mulf %66, %64 : vector<32x128xf32>
    %68 = arith.addf %50, %67 : vector<32x128xf32>
    %69 = vector.extract_strided_slice %6 {offsets = [0, 1], sizes = [32, 1], strides = [1, 1]} : vector<32x3xf32> to vector<32x1xf32>
    %70 = vector.broadcast %69 : vector<32x1xf32> to vector<32x128xf32>
    %71 = arith.mulf %70, %49 : vector<32x128xf32>
    %72 = arith.addf %68, %71 : vector<32x128xf32>
    %c127_i32 = arith.constant 127 : i32
    %73 = tpu.dynamic_rotate %49 by %c127_i32 dim 1 : vector<32x128xf32>, i32 -> vector<32x128xf32>
    %c1_i32_23 = arith.constant 1 : i32
    %74 = vector.broadcast %c1_i32_23 : i32 to vector<1x128xi32>
    %75 = arith.addi %2, %74 : vector<1x128xi32>
    %c0_i32_24 = arith.constant 0 : i32
    %76 = vector.broadcast %c0_i32_24 : i32 to vector<1x128xi32>
    %77 = arith.cmpi sge, %75, %76 : vector<1x128xi32>
    %c1_i32_25 = arith.constant 1 : i32
    %78 = vector.broadcast %c1_i32_25 : i32 to vector<1x128xi32>
    %79 = arith.addi %2, %78 : vector<1x128xi32>
    %c128_i32_26 = arith.constant 128 : i32
    %80 = vector.broadcast %c128_i32_26 : i32 to vector<1x128xi32>
    %81 = arith.cmpi slt, %79, %80 : vector<1x128xi32>
    %82 = arith.andi %77, %81 : vector<1x128xi1>
    %cst_27 = arith.constant 0.000000e+00 : f32
    %83 = vector.shape_cast %82 : vector<1x128xi1> to vector<1x128xi1>
    %84 = vector.broadcast %83 : vector<1x128xi1> to vector<32x128xi1>
    %85 = vector.broadcast %cst_27 : f32 to vector<32x128xf32>
    %86 = arith.select %84, %73, %85 : vector<32x128xi1>, vector<32x128xf32>
    %87 = vector.extract_strided_slice %6 {offsets = [0, 2], sizes = [32, 1], strides = [1, 1]} : vector<32x3xf32> to vector<32x1xf32>
    %88 = vector.broadcast %87 : vector<32x1xf32> to vector<32x128xf32>
    %89 = arith.mulf %88, %86 : vector<32x128xf32>
    %90 = arith.addf %72, %89 : vector<32x128xf32>
    %91 = vector.broadcast %14 : vector<32x1xf32> to vector<32x128xf32>
    %92 = arith.addf %90, %91 : vector<32x128xf32>
    %cst_28 = arith.constant 0.000000e+00 : f32
    %93 = vector.broadcast %cst_28 : f32 to vector<32x128xf32>
    %94 = arith.cmpf oge, %92, %93 : vector<32x128xf32>
    %95 = vector.broadcast %19 : vector<1x1xf32> to vector<32x128xf32>
    %96 = arith.mulf %95, %92 : vector<32x128xf32>
    %97 = arith.select %94, %92, %96 : vector<32x128xi1>, vector<32x128xf32>
    %cst_29 = arith.constant dense<0.000000e+00> : vector<128xf32>
    %98 = vector.multi_reduction <add>, %97, %cst_29 [0] : vector<32x128xf32> to vector<128xf32>
    %99 = vector.shape_cast %98 : vector<128xf32> to vector<1x128xf32>
    %cst_30 = arith.constant 3.200000e+01 : f32
    %100 = vector.broadcast %cst_30 : f32 to vector<1x128xf32>
    %101 = arith.divf %99, %100 : vector<1x128xf32>
    %102 = vector.broadcast %101 : vector<1x128xf32> to vector<32x128xf32>
    %103 = arith.subf %97, %102 : vector<32x128xf32>
    %104 = arith.mulf %103, %103 : vector<32x128xf32>
    %cst_31 = arith.constant dense<0.000000e+00> : vector<128xf32>
    %105 = vector.multi_reduction <add>, %104, %cst_31 [0] : vector<32x128xf32> to vector<128xf32>
    %106 = vector.shape_cast %105 : vector<128xf32> to vector<1x128xf32>
    %cst_32 = arith.constant 3.200000e+01 : f32
    %107 = vector.broadcast %cst_32 : f32 to vector<1x128xf32>
    %108 = arith.divf %106, %107 : vector<1x128xf32>
    %109 = vector.broadcast %101 : vector<1x128xf32> to vector<32x128xf32>
    %110 = arith.subf %97, %109 : vector<32x128xf32>
    %cst_33 = arith.constant 9.99999974E-6 : f32
    %111 = vector.broadcast %cst_33 : f32 to vector<1x128xf32>
    %112 = arith.addf %108, %111 : vector<1x128xf32>
    %113 = math.rsqrt %112 : vector<1x128xf32>
    %114 = vector.broadcast %113 : vector<1x128xf32> to vector<32x128xf32>
    %115 = arith.mulf %110, %114 : vector<32x128xf32>
    %116 = vector.broadcast %15 : vector<32x1xf32> to vector<32x128xf32>
    %117 = arith.mulf %115, %116 : vector<32x128xf32>
    %118 = vector.broadcast %16 : vector<32x1xf32> to vector<32x128xf32>
    %119 = arith.addf %117, %118 : vector<32x128xf32>
    %cst_34 = arith.constant dense<0.000000e+00> : vector<16x128xf32>
    %120 = tpu.matmul %8, %119, %cst_34 {dimension_numbers = #tpu.dot_dimension_numbers<[1], [0], [0], [1], [0, 0, 1, 1], [], []>} : vector<16x32xf32>, vector<32x128xf32>, vector<16x128xf32> -> vector<16x128xf32>
    %121 = arith.addf %1, %120 : vector<16x128xf32>
    %122 = vector.broadcast %17 : vector<16x1xf32> to vector<16x128xf32>
    %123 = arith.addf %121, %122 : vector<16x128xf32>
    %c1 = arith.constant 1 : index
    %c0_35 = arith.constant 0 : index
    %c0_36 = arith.constant 0 : index
    %124 = vector.load %arg2[%c1, %c0_35, %c0_36] : memref<3x32x16xf32, #tpu.memory_space<vmem>>, vector<1x32x16xf32>
    %125 = vector.shape_cast %124 : vector<1x32x16xf32> to vector<32x16xf32>
    %c1_37 = arith.constant 1 : index
    %c0_38 = arith.constant 0 : index
    %c0_39 = arith.constant 0 : index
    %126 = vector.load %arg3[%c1_37, %c0_38, %c0_39] : memref<3x32x3xf32, #tpu.memory_space<vmem>>, vector<1x32x3xf32>
    %127 = vector.shape_cast %126 : vector<1x32x3xf32> to vector<32x3xf32>
    %c1_40 = arith.constant 1 : index
    %c0_41 = arith.constant 0 : index
    %c0_42 = arith.constant 0 : index
    %128 = vector.load %arg4[%c1_40, %c0_41, %c0_42] : memref<3x16x32xf32, #tpu.memory_space<vmem>>, vector<1x16x32xf32>
    %129 = vector.shape_cast %128 : vector<1x16x32xf32> to vector<16x32xf32>
    %c1_43 = arith.constant 1 : index
    %c0_44 = arith.constant 0 : index
    %c0_45 = arith.constant 0 : index
    %130 = vector.load %arg5[%c1_43, %c0_44, %c0_45] : memref<3x32x8xf32, #tpu.memory_space<vmem>>, vector<1x32x8xf32>
    %131 = vector.shape_cast %130 : vector<1x32x8xf32> to vector<32x8xf32>
    %132 = vector.extract_strided_slice %131 {offsets = [0, 0], sizes = [32, 1], strides = [1, 1]} : vector<32x8xf32> to vector<32x1xf32>
    %133 = vector.extract_strided_slice %131 {offsets = [0, 1], sizes = [32, 1], strides = [1, 1]} : vector<32x8xf32> to vector<32x1xf32>
    %134 = vector.extract_strided_slice %131 {offsets = [0, 2], sizes = [32, 1], strides = [1, 1]} : vector<32x8xf32> to vector<32x1xf32>
    %135 = vector.extract_strided_slice %131 {offsets = [0, 3], sizes = [32, 1], strides = [1, 1]} : vector<32x8xf32> to vector<32x1xf32>
    %136 = vector.extract_strided_slice %131 {offsets = [0, 4], sizes = [32, 1], strides = [1, 1]} : vector<32x8xf32> to vector<32x1xf32>
    %137 = vector.extract_strided_slice %131 {offsets = [0, 5], sizes = [32, 1], strides = [1, 1]} : vector<32x8xf32> to vector<32x1xf32>
    %138 = vector.extract_strided_slice %131 {offsets = [0, 6], sizes = [16, 1], strides = [1, 1]} : vector<32x8xf32> to vector<16x1xf32>
    %139 = vector.extract_strided_slice %131 {offsets = [0, 7], sizes = [1, 1], strides = [1, 1]} : vector<32x8xf32> to vector<1x1xf32>
    %140 = vector.extract_strided_slice %131 {offsets = [1, 7], sizes = [1, 1], strides = [1, 1]} : vector<32x8xf32> to vector<1x1xf32>
    %cst_46 = arith.constant dense<0.000000e+00> : vector<32x128xf32>
    %141 = tpu.matmul %125, %123, %cst_46 {dimension_numbers = #tpu.dot_dimension_numbers<[1], [0], [0], [1], [0, 0, 1, 1], [], []>} : vector<32x16xf32>, vector<16x128xf32>, vector<32x128xf32> -> vector<32x128xf32>
    %142 = vector.broadcast %132 : vector<32x1xf32> to vector<32x128xf32>
    %143 = arith.addf %141, %142 : vector<32x128xf32>
    %cst_47 = arith.constant 0.000000e+00 : f32
    %144 = vector.broadcast %cst_47 : f32 to vector<32x128xf32>
    %145 = arith.cmpf oge, %143, %144 : vector<32x128xf32>
    %146 = vector.broadcast %139 : vector<1x1xf32> to vector<32x128xf32>
    %147 = arith.mulf %146, %143 : vector<32x128xf32>
    %148 = arith.select %145, %143, %147 : vector<32x128xi1>, vector<32x128xf32>
    %cst_48 = arith.constant dense<0.000000e+00> : vector<128xf32>
    %149 = vector.multi_reduction <add>, %148, %cst_48 [0] : vector<32x128xf32> to vector<128xf32>
    %150 = vector.shape_cast %149 : vector<128xf32> to vector<1x128xf32>
    %cst_49 = arith.constant 3.200000e+01 : f32
    %151 = vector.broadcast %cst_49 : f32 to vector<1x128xf32>
    %152 = arith.divf %150, %151 : vector<1x128xf32>
    %153 = vector.broadcast %152 : vector<1x128xf32> to vector<32x128xf32>
    %154 = arith.subf %148, %153 : vector<32x128xf32>
    %155 = arith.mulf %154, %154 : vector<32x128xf32>
    %cst_50 = arith.constant dense<0.000000e+00> : vector<128xf32>
    %156 = vector.multi_reduction <add>, %155, %cst_50 [0] : vector<32x128xf32> to vector<128xf32>
    %157 = vector.shape_cast %156 : vector<128xf32> to vector<1x128xf32>
    %cst_51 = arith.constant 3.200000e+01 : f32
    %158 = vector.broadcast %cst_51 : f32 to vector<1x128xf32>
    %159 = arith.divf %157, %158 : vector<1x128xf32>
    %160 = vector.broadcast %152 : vector<1x128xf32> to vector<32x128xf32>
    %161 = arith.subf %148, %160 : vector<32x128xf32>
    %cst_52 = arith.constant 9.99999974E-6 : f32
    %162 = vector.broadcast %cst_52 : f32 to vector<1x128xf32>
    %163 = arith.addf %159, %162 : vector<1x128xf32>
    %164 = math.rsqrt %163 : vector<1x128xf32>
    %165 = vector.broadcast %164 : vector<1x128xf32> to vector<32x128xf32>
    %166 = arith.mulf %161, %165 : vector<32x128xf32>
    %167 = vector.broadcast %133 : vector<32x1xf32> to vector<32x128xf32>
    %168 = arith.mulf %166, %167 : vector<32x128xf32>
    %169 = vector.broadcast %134 : vector<32x1xf32> to vector<32x128xf32>
    %170 = arith.addf %168, %169 : vector<32x128xf32>
    %cst_53 = arith.constant 0.000000e+00 : f32
    %171 = vector.broadcast %cst_53 : f32 to vector<32x128xf32>
    %c2_i32 = arith.constant 2 : i32
    %172 = tpu.dynamic_rotate %170 by %c2_i32 dim 1 : vector<32x128xf32>, i32 -> vector<32x128xf32>
    %c-2_i32 = arith.constant -2 : i32
    %173 = vector.broadcast %c-2_i32 : i32 to vector<1x128xi32>
    %174 = arith.addi %2, %173 : vector<1x128xi32>
    %c0_i32_54 = arith.constant 0 : i32
    %175 = vector.broadcast %c0_i32_54 : i32 to vector<1x128xi32>
    %176 = arith.cmpi sge, %174, %175 : vector<1x128xi32>
    %c-2_i32_55 = arith.constant -2 : i32
    %177 = vector.broadcast %c-2_i32_55 : i32 to vector<1x128xi32>
    %178 = arith.addi %2, %177 : vector<1x128xi32>
    %c128_i32_56 = arith.constant 128 : i32
    %179 = vector.broadcast %c128_i32_56 : i32 to vector<1x128xi32>
    %180 = arith.cmpi slt, %178, %179 : vector<1x128xi32>
    %181 = arith.andi %176, %180 : vector<1x128xi1>
    %cst_57 = arith.constant 0.000000e+00 : f32
    %182 = vector.shape_cast %181 : vector<1x128xi1> to vector<1x128xi1>
    %183 = vector.broadcast %182 : vector<1x128xi1> to vector<32x128xi1>
    %184 = vector.broadcast %cst_57 : f32 to vector<32x128xf32>
    %185 = arith.select %183, %172, %184 : vector<32x128xi1>, vector<32x128xf32>
    %186 = vector.extract_strided_slice %127 {offsets = [0, 0], sizes = [32, 1], strides = [1, 1]} : vector<32x3xf32> to vector<32x1xf32>
    %187 = vector.broadcast %186 : vector<32x1xf32> to vector<32x128xf32>
    %188 = arith.mulf %187, %185 : vector<32x128xf32>
    %189 = arith.addf %171, %188 : vector<32x128xf32>
    %190 = vector.extract_strided_slice %127 {offsets = [0, 1], sizes = [32, 1], strides = [1, 1]} : vector<32x3xf32> to vector<32x1xf32>
    %191 = vector.broadcast %190 : vector<32x1xf32> to vector<32x128xf32>
    %192 = arith.mulf %191, %170 : vector<32x128xf32>
    %193 = arith.addf %189, %192 : vector<32x128xf32>
    %c126_i32 = arith.constant 126 : i32
    %194 = tpu.dynamic_rotate %170 by %c126_i32 dim 1 : vector<32x128xf32>, i32 -> vector<32x128xf32>
    %c2_i32_58 = arith.constant 2 : i32
    %195 = vector.broadcast %c2_i32_58 : i32 to vector<1x128xi32>
    %196 = arith.addi %2, %195 : vector<1x128xi32>
    %c0_i32_59 = arith.constant 0 : i32
    %197 = vector.broadcast %c0_i32_59 : i32 to vector<1x128xi32>
    %198 = arith.cmpi sge, %196, %197 : vector<1x128xi32>
    %c2_i32_60 = arith.constant 2 : i32
    %199 = vector.broadcast %c2_i32_60 : i32 to vector<1x128xi32>
    %200 = arith.addi %2, %199 : vector<1x128xi32>
    %c128_i32_61 = arith.constant 128 : i32
    %201 = vector.broadcast %c128_i32_61 : i32 to vector<1x128xi32>
    %202 = arith.cmpi slt, %200, %201 : vector<1x128xi32>
    %203 = arith.andi %198, %202 : vector<1x128xi1>
    %cst_62 = arith.constant 0.000000e+00 : f32
    %204 = vector.shape_cast %203 : vector<1x128xi1> to vector<1x128xi1>
    %205 = vector.broadcast %204 : vector<1x128xi1> to vector<32x128xi1>
    %206 = vector.broadcast %cst_62 : f32 to vector<32x128xf32>
    %207 = arith.select %205, %194, %206 : vector<32x128xi1>, vector<32x128xf32>
    %208 = vector.extract_strided_slice %127 {offsets = [0, 2], sizes = [32, 1], strides = [1, 1]} : vector<32x3xf32> to vector<32x1xf32>
    %209 = vector.broadcast %208 : vector<32x1xf32> to vector<32x128xf32>
    %210 = arith.mulf %209, %207 : vector<32x128xf32>
    %211 = arith.addf %193, %210 : vector<32x128xf32>
    %212 = vector.broadcast %135 : vector<32x1xf32> to vector<32x128xf32>
    %213 = arith.addf %211, %212 : vector<32x128xf32>
    %cst_63 = arith.constant 0.000000e+00 : f32
    %214 = vector.broadcast %cst_63 : f32 to vector<32x128xf32>
    %215 = arith.cmpf oge, %213, %214 : vector<32x128xf32>
    %216 = vector.broadcast %140 : vector<1x1xf32> to vector<32x128xf32>
    %217 = arith.mulf %216, %213 : vector<32x128xf32>
    %218 = arith.select %215, %213, %217 : vector<32x128xi1>, vector<32x128xf32>
    %cst_64 = arith.constant dense<0.000000e+00> : vector<128xf32>
    %219 = vector.multi_reduction <add>, %218, %cst_64 [0] : vector<32x128xf32> to vector<128xf32>
    %220 = vector.shape_cast %219 : vector<128xf32> to vector<1x128xf32>
    %cst_65 = arith.constant 3.200000e+01 : f32
    %221 = vector.broadcast %cst_65 : f32 to vector<1x128xf32>
    %222 = arith.divf %220, %221 : vector<1x128xf32>
    %223 = vector.broadcast %222 : vector<1x128xf32> to vector<32x128xf32>
    %224 = arith.subf %218, %223 : vector<32x128xf32>
    %225 = arith.mulf %224, %224 : vector<32x128xf32>
    %cst_66 = arith.constant dense<0.000000e+00> : vector<128xf32>
    %226 = vector.multi_reduction <add>, %225, %cst_66 [0] : vector<32x128xf32> to vector<128xf32>
    %227 = vector.shape_cast %226 : vector<128xf32> to vector<1x128xf32>
    %cst_67 = arith.constant 3.200000e+01 : f32
    %228 = vector.broadcast %cst_67 : f32 to vector<1x128xf32>
    %229 = arith.divf %227, %228 : vector<1x128xf32>
    %230 = vector.broadcast %222 : vector<1x128xf32> to vector<32x128xf32>
    %231 = arith.subf %218, %230 : vector<32x128xf32>
    %cst_68 = arith.constant 9.99999974E-6 : f32
    %232 = vector.broadcast %cst_68 : f32 to vector<1x128xf32>
    %233 = arith.addf %229, %232 : vector<1x128xf32>
    %234 = math.rsqrt %233 : vector<1x128xf32>
    %235 = vector.broadcast %234 : vector<1x128xf32> to vector<32x128xf32>
    %236 = arith.mulf %231, %235 : vector<32x128xf32>
    %237 = vector.broadcast %136 : vector<32x1xf32> to vector<32x128xf32>
    %238 = arith.mulf %236, %237 : vector<32x128xf32>
    %239 = vector.broadcast %137 : vector<32x1xf32> to vector<32x128xf32>
    %240 = arith.addf %238, %239 : vector<32x128xf32>
    %cst_69 = arith.constant dense<0.000000e+00> : vector<16x128xf32>
    %241 = tpu.matmul %129, %240, %cst_69 {dimension_numbers = #tpu.dot_dimension_numbers<[1], [0], [0], [1], [0, 0, 1, 1], [], []>} : vector<16x32xf32>, vector<32x128xf32>, vector<16x128xf32> -> vector<16x128xf32>
    %242 = arith.addf %123, %241 : vector<16x128xf32>
    %243 = vector.broadcast %138 : vector<16x1xf32> to vector<16x128xf32>
    %244 = arith.addf %242, %243 : vector<16x128xf32>
    %c2 = arith.constant 2 : index
    %c0_70 = arith.constant 0 : index
    %c0_71 = arith.constant 0 : index
    %245 = vector.load %arg2[%c2, %c0_70, %c0_71] : memref<3x32x16xf32, #tpu.memory_space<vmem>>, vector<1x32x16xf32>
    %246 = vector.shape_cast %245 : vector<1x32x16xf32> to vector<32x16xf32>
    %c2_72 = arith.constant 2 : index
    %c0_73 = arith.constant 0 : index
    %c0_74 = arith.constant 0 : index
    %247 = vector.load %arg3[%c2_72, %c0_73, %c0_74] : memref<3x32x3xf32, #tpu.memory_space<vmem>>, vector<1x32x3xf32>
    %248 = vector.shape_cast %247 : vector<1x32x3xf32> to vector<32x3xf32>
    %c2_75 = arith.constant 2 : index
    %c0_76 = arith.constant 0 : index
    %c0_77 = arith.constant 0 : index
    %249 = vector.load %arg4[%c2_75, %c0_76, %c0_77] : memref<3x16x32xf32, #tpu.memory_space<vmem>>, vector<1x16x32xf32>
    %250 = vector.shape_cast %249 : vector<1x16x32xf32> to vector<16x32xf32>
    %c2_78 = arith.constant 2 : index
    %c0_79 = arith.constant 0 : index
    %c0_80 = arith.constant 0 : index
    %251 = vector.load %arg5[%c2_78, %c0_79, %c0_80] : memref<3x32x8xf32, #tpu.memory_space<vmem>>, vector<1x32x8xf32>
    %252 = vector.shape_cast %251 : vector<1x32x8xf32> to vector<32x8xf32>
    %253 = vector.extract_strided_slice %252 {offsets = [0, 0], sizes = [32, 1], strides = [1, 1]} : vector<32x8xf32> to vector<32x1xf32>
    %254 = vector.extract_strided_slice %252 {offsets = [0, 1], sizes = [32, 1], strides = [1, 1]} : vector<32x8xf32> to vector<32x1xf32>
    %255 = vector.extract_strided_slice %252 {offsets = [0, 2], sizes = [32, 1], strides = [1, 1]} : vector<32x8xf32> to vector<32x1xf32>
    %256 = vector.extract_strided_slice %252 {offsets = [0, 3], sizes = [32, 1], strides = [1, 1]} : vector<32x8xf32> to vector<32x1xf32>
    %257 = vector.extract_strided_slice %252 {offsets = [0, 4], sizes = [32, 1], strides = [1, 1]} : vector<32x8xf32> to vector<32x1xf32>
    %258 = vector.extract_strided_slice %252 {offsets = [0, 5], sizes = [32, 1], strides = [1, 1]} : vector<32x8xf32> to vector<32x1xf32>
    %259 = vector.extract_strided_slice %252 {offsets = [0, 6], sizes = [16, 1], strides = [1, 1]} : vector<32x8xf32> to vector<16x1xf32>
    %260 = vector.extract_strided_slice %252 {offsets = [0, 7], sizes = [1, 1], strides = [1, 1]} : vector<32x8xf32> to vector<1x1xf32>
    %261 = vector.extract_strided_slice %252 {offsets = [1, 7], sizes = [1, 1], strides = [1, 1]} : vector<32x8xf32> to vector<1x1xf32>
    %cst_81 = arith.constant dense<0.000000e+00> : vector<32x128xf32>
    %262 = tpu.matmul %246, %244, %cst_81 {dimension_numbers = #tpu.dot_dimension_numbers<[1], [0], [0], [1], [0, 0, 1, 1], [], []>} : vector<32x16xf32>, vector<16x128xf32>, vector<32x128xf32> -> vector<32x128xf32>
    %263 = vector.broadcast %253 : vector<32x1xf32> to vector<32x128xf32>
    %264 = arith.addf %262, %263 : vector<32x128xf32>
    %cst_82 = arith.constant 0.000000e+00 : f32
    %265 = vector.broadcast %cst_82 : f32 to vector<32x128xf32>
    %266 = arith.cmpf oge, %264, %265 : vector<32x128xf32>
    %267 = vector.broadcast %260 : vector<1x1xf32> to vector<32x128xf32>
    %268 = arith.mulf %267, %264 : vector<32x128xf32>
    %269 = arith.select %266, %264, %268 : vector<32x128xi1>, vector<32x128xf32>
    %cst_83 = arith.constant dense<0.000000e+00> : vector<128xf32>
    %270 = vector.multi_reduction <add>, %269, %cst_83 [0] : vector<32x128xf32> to vector<128xf32>
    %271 = vector.shape_cast %270 : vector<128xf32> to vector<1x128xf32>
    %cst_84 = arith.constant 3.200000e+01 : f32
    %272 = vector.broadcast %cst_84 : f32 to vector<1x128xf32>
    %273 = arith.divf %271, %272 : vector<1x128xf32>
    %274 = vector.broadcast %273 : vector<1x128xf32> to vector<32x128xf32>
    %275 = arith.subf %269, %274 : vector<32x128xf32>
    %276 = arith.mulf %275, %275 : vector<32x128xf32>
    %cst_85 = arith.constant dense<0.000000e+00> : vector<128xf32>
    %277 = vector.multi_reduction <add>, %276, %cst_85 [0] : vector<32x128xf32> to vector<128xf32>
    %278 = vector.shape_cast %277 : vector<128xf32> to vector<1x128xf32>
    %cst_86 = arith.constant 3.200000e+01 : f32
    %279 = vector.broadcast %cst_86 : f32 to vector<1x128xf32>
    %280 = arith.divf %278, %279 : vector<1x128xf32>
    %281 = vector.broadcast %273 : vector<1x128xf32> to vector<32x128xf32>
    %282 = arith.subf %269, %281 : vector<32x128xf32>
    %cst_87 = arith.constant 9.99999974E-6 : f32
    %283 = vector.broadcast %cst_87 : f32 to vector<1x128xf32>
    %284 = arith.addf %280, %283 : vector<1x128xf32>
    %285 = math.rsqrt %284 : vector<1x128xf32>
    %286 = vector.broadcast %285 : vector<1x128xf32> to vector<32x128xf32>
    %287 = arith.mulf %282, %286 : vector<32x128xf32>
    %288 = vector.broadcast %254 : vector<32x1xf32> to vector<32x128xf32>
    %289 = arith.mulf %287, %288 : vector<32x128xf32>
    %290 = vector.broadcast %255 : vector<32x1xf32> to vector<32x128xf32>
    %291 = arith.addf %289, %290 : vector<32x128xf32>
    %cst_88 = arith.constant 0.000000e+00 : f32
    %292 = vector.broadcast %cst_88 : f32 to vector<32x128xf32>
    %c4_i32 = arith.constant 4 : i32
    %293 = tpu.dynamic_rotate %291 by %c4_i32 dim 1 : vector<32x128xf32>, i32 -> vector<32x128xf32>
    %c-4_i32 = arith.constant -4 : i32
    %294 = vector.broadcast %c-4_i32 : i32 to vector<1x128xi32>
    %295 = arith.addi %2, %294 : vector<1x128xi32>
    %c0_i32_89 = arith.constant 0 : i32
    %296 = vector.broadcast %c0_i32_89 : i32 to vector<1x128xi32>
    %297 = arith.cmpi sge, %295, %296 : vector<1x128xi32>
    %c-4_i32_90 = arith.constant -4 : i32
    %298 = vector.broadcast %c-4_i32_90 : i32 to vector<1x128xi32>
    %299 = arith.addi %2, %298 : vector<1x128xi32>
    %c128_i32_91 = arith.constant 128 : i32
    %300 = vector.broadcast %c128_i32_91 : i32 to vector<1x128xi32>
    %301 = arith.cmpi slt, %299, %300 : vector<1x128xi32>
    %302 = arith.andi %297, %301 : vector<1x128xi1>
    %cst_92 = arith.constant 0.000000e+00 : f32
    %303 = vector.shape_cast %302 : vector<1x128xi1> to vector<1x128xi1>
    %304 = vector.broadcast %303 : vector<1x128xi1> to vector<32x128xi1>
    %305 = vector.broadcast %cst_92 : f32 to vector<32x128xf32>
    %306 = arith.select %304, %293, %305 : vector<32x128xi1>, vector<32x128xf32>
    %307 = vector.extract_strided_slice %248 {offsets = [0, 0], sizes = [32, 1], strides = [1, 1]} : vector<32x3xf32> to vector<32x1xf32>
    %308 = vector.broadcast %307 : vector<32x1xf32> to vector<32x128xf32>
    %309 = arith.mulf %308, %306 : vector<32x128xf32>
    %310 = arith.addf %292, %309 : vector<32x128xf32>
    %311 = vector.extract_strided_slice %248 {offsets = [0, 1], sizes = [32, 1], strides = [1, 1]} : vector<32x3xf32> to vector<32x1xf32>
    %312 = vector.broadcast %311 : vector<32x1xf32> to vector<32x128xf32>
    %313 = arith.mulf %312, %291 : vector<32x128xf32>
    %314 = arith.addf %310, %313 : vector<32x128xf32>
    %c124_i32 = arith.constant 124 : i32
    %315 = tpu.dynamic_rotate %291 by %c124_i32 dim 1 : vector<32x128xf32>, i32 -> vector<32x128xf32>
    %c4_i32_93 = arith.constant 4 : i32
    %316 = vector.broadcast %c4_i32_93 : i32 to vector<1x128xi32>
    %317 = arith.addi %2, %316 : vector<1x128xi32>
    %c0_i32_94 = arith.constant 0 : i32
    %318 = vector.broadcast %c0_i32_94 : i32 to vector<1x128xi32>
    %319 = arith.cmpi sge, %317, %318 : vector<1x128xi32>
    %c4_i32_95 = arith.constant 4 : i32
    %320 = vector.broadcast %c4_i32_95 : i32 to vector<1x128xi32>
    %321 = arith.addi %2, %320 : vector<1x128xi32>
    %c128_i32_96 = arith.constant 128 : i32
    %322 = vector.broadcast %c128_i32_96 : i32 to vector<1x128xi32>
    %323 = arith.cmpi slt, %321, %322 : vector<1x128xi32>
    %324 = arith.andi %319, %323 : vector<1x128xi1>
    %cst_97 = arith.constant 0.000000e+00 : f32
    %325 = vector.shape_cast %324 : vector<1x128xi1> to vector<1x128xi1>
    %326 = vector.broadcast %325 : vector<1x128xi1> to vector<32x128xi1>
    %327 = vector.broadcast %cst_97 : f32 to vector<32x128xf32>
    %328 = arith.select %326, %315, %327 : vector<32x128xi1>, vector<32x128xf32>
    %329 = vector.extract_strided_slice %248 {offsets = [0, 2], sizes = [32, 1], strides = [1, 1]} : vector<32x3xf32> to vector<32x1xf32>
    %330 = vector.broadcast %329 : vector<32x1xf32> to vector<32x128xf32>
    %331 = arith.mulf %330, %328 : vector<32x128xf32>
    %332 = arith.addf %314, %331 : vector<32x128xf32>
    %333 = vector.broadcast %256 : vector<32x1xf32> to vector<32x128xf32>
    %334 = arith.addf %332, %333 : vector<32x128xf32>
    %cst_98 = arith.constant 0.000000e+00 : f32
    %335 = vector.broadcast %cst_98 : f32 to vector<32x128xf32>
    %336 = arith.cmpf oge, %334, %335 : vector<32x128xf32>
    %337 = vector.broadcast %261 : vector<1x1xf32> to vector<32x128xf32>
    %338 = arith.mulf %337, %334 : vector<32x128xf32>
    %339 = arith.select %336, %334, %338 : vector<32x128xi1>, vector<32x128xf32>
    %cst_99 = arith.constant dense<0.000000e+00> : vector<128xf32>
    %340 = vector.multi_reduction <add>, %339, %cst_99 [0] : vector<32x128xf32> to vector<128xf32>
    %341 = vector.shape_cast %340 : vector<128xf32> to vector<1x128xf32>
    %cst_100 = arith.constant 3.200000e+01 : f32
    %342 = vector.broadcast %cst_100 : f32 to vector<1x128xf32>
    %343 = arith.divf %341, %342 : vector<1x128xf32>
    %344 = vector.broadcast %343 : vector<1x128xf32> to vector<32x128xf32>
    %345 = arith.subf %339, %344 : vector<32x128xf32>
    %346 = arith.mulf %345, %345 : vector<32x128xf32>
    %cst_101 = arith.constant dense<0.000000e+00> : vector<128xf32>
    %347 = vector.multi_reduction <add>, %346, %cst_101 [0] : vector<32x128xf32> to vector<128xf32>
    %348 = vector.shape_cast %347 : vector<128xf32> to vector<1x128xf32>
    %cst_102 = arith.constant 3.200000e+01 : f32
    %349 = vector.broadcast %cst_102 : f32 to vector<1x128xf32>
    %350 = arith.divf %348, %349 : vector<1x128xf32>
    %351 = vector.broadcast %343 : vector<1x128xf32> to vector<32x128xf32>
    %352 = arith.subf %339, %351 : vector<32x128xf32>
    %cst_103 = arith.constant 9.99999974E-6 : f32
    %353 = vector.broadcast %cst_103 : f32 to vector<1x128xf32>
    %354 = arith.addf %350, %353 : vector<1x128xf32>
    %355 = math.rsqrt %354 : vector<1x128xf32>
    %356 = vector.broadcast %355 : vector<1x128xf32> to vector<32x128xf32>
    %357 = arith.mulf %352, %356 : vector<32x128xf32>
    %358 = vector.broadcast %257 : vector<32x1xf32> to vector<32x128xf32>
    %359 = arith.mulf %357, %358 : vector<32x128xf32>
    %360 = vector.broadcast %258 : vector<32x1xf32> to vector<32x128xf32>
    %361 = arith.addf %359, %360 : vector<32x128xf32>
    %cst_104 = arith.constant dense<0.000000e+00> : vector<16x128xf32>
    %362 = tpu.matmul %250, %361, %cst_104 {dimension_numbers = #tpu.dot_dimension_numbers<[1], [0], [0], [1], [0, 0, 1, 1], [], []>} : vector<16x32xf32>, vector<32x128xf32>, vector<16x128xf32> -> vector<16x128xf32>
    %363 = arith.addf %244, %362 : vector<16x128xf32>
    %364 = vector.broadcast %259 : vector<16x1xf32> to vector<16x128xf32>
    %365 = arith.addf %363, %364 : vector<16x128xf32>
    %c0_105 = arith.constant 0 : index
    %c0_106 = arith.constant 0 : index
    %c0_107 = arith.constant 0 : index
    %366 = vector.load %arg6[%c0_105, %c0_106, %c0_107] : memref<1x16x128xf32, #tpu.memory_space<vmem>>, vector<1x16x128xf32>
    %367 = vector.shape_cast %366 : vector<1x16x128xf32> to vector<16x128xf32>
    %368 = vector.shape_cast %365 : vector<16x128xf32> to vector<1x16x128xf32>
    tpu.vector_store %arg6[%c0_105, %c0_106, %c0_107], %368 {strides = array<i32>} : memref<1x16x128xf32, #tpu.memory_space<vmem>>, vector<1x16x128xf32>,
    return
  }
  func.func @transform_0(%arg0: i32) -> (i32, i32, i32) {
    %c0_i32 = arith.constant 0 : i32
    %c0_i32_0 = arith.constant 0 : i32
    %c0_i32_1 = arith.constant 0 : i32
    return %arg0, %c0_i32, %c0_i32_0 : i32, i32, i32
  }
  func.func @transform_1(%arg0: i32) -> (i32, i32, i32) {
    %c0_i32 = arith.constant 0 : i32
    %c0_i32_0 = arith.constant 0 : i32
    %c0_i32_1 = arith.constant 0 : i32
    %c0_i32_2 = arith.constant 0 : i32
    return %c0_i32, %c0_i32_0, %c0_i32_1 : i32, i32, i32
  }
  func.func @transform_2(%arg0: i32) -> (i32, i32, i32) {
    %c0_i32 = arith.constant 0 : i32
    %c0_i32_0 = arith.constant 0 : i32
    %c0_i32_1 = arith.constant 0 : i32
    %c0_i32_2 = arith.constant 0 : i32
    return %c0_i32, %c0_i32_0, %c0_i32_1 : i32, i32, i32
  }
  func.func @transform_3(%arg0: i32) -> (i32, i32, i32) {
    %c0_i32 = arith.constant 0 : i32
    %c0_i32_0 = arith.constant 0 : i32
    %c0_i32_1 = arith.constant 0 : i32
    %c0_i32_2 = arith.constant 0 : i32
    return %c0_i32, %c0_i32_0, %c0_i32_1 : i32, i32, i32
  }
  func.func @transform_4(%arg0: i32) -> (i32, i32, i32) {
    %c0_i32 = arith.constant 0 : i32
    %c0_i32_0 = arith.constant 0 : i32
    %c0_i32_1 = arith.constant 0 : i32
    %c0_i32_2 = arith.constant 0 : i32
    return %c0_i32, %c0_i32_0, %c0_i32_1 : i32, i32, i32
  }
  func.func @transform_5(%arg0: i32) -> (i32, i32, i32) {
    %c0_i32 = arith.constant 0 : i32
    %c0_i32_0 = arith.constant 0 : i32
    %c0_i32_1 = arith.constant 0 : i32
    return %arg0, %c0_i32, %c0_i32_0 : i32, i32, i32
  }
}

</mosaic_0001>

<bundles_post_ra>
// kernel: tpu_custom_call.1
= control target key start
LH: loop header
LB: loop body
LE: loop exit
PB: predicated region body
PF: predicated region fallthrough
CT: control target
= control target key end

     0   :  { %10 = vsyncpa [#allocation3], 0  ;;  %s2605_s0 = inlined_call_operand.vmem [shape: f32[2,16,128], index: 0, kind: input, shape index: {}]   ;;  %s2606_s1 = inlined_call_operand.vmem [shape: f32[3,32,16], index: 1, kind: input, shape index: {}]   ;;  %s2607_s2 = inlined_call_operand.vmem [shape: f32[3,32,3], index: 2, kind: input, shape index: {}]   ;;  %s2608_s3 = inlined_call_operand.vmem [shape: f32[3,16,32], index: 3, kind: input, shape index: {}]   ;;  %s2609_s4 = inlined_call_operand.vmem [shape: f32[3,32,8], index: 4, kind: input, shape index: {}]   ;;  %s2610_s5 = inlined_call_operand.hbm [shape: f32[2,16,128], index: 5, kind: output, shape index: {}]  }
   0x1   :  { %12 = vsyncpa [#allocation3 + $0x1], 0  ;;  %s2024_s18 = smov 0   ;;  %s2026_s19 = smov 0  }
   0x2   :  { %s2028_s20 = smov 0   ;;  %s2030_s21 = smov 0  }
   0x3 LB: > { %s2045_s22 = sadd.s32 4294967295, %s1975_s21   ;;  %s1671_s23 = sadd.s32 4294967294, %s1975_s21   ;;  %s1975_s21 = sphi %s2030_s21, %s2616_s21   ;;  %s1971_s20 = sphi %s2028_s20, %s2615_s20   ;;  %s1967_s19 = sphi %s2026_s19, %s2614_s19   ;;  %s1963_s18 = sphi %s2024_s18, %s2613_s18  }
   0x4   : > { %s2049_s24 = sadd.s32 1, %s1975_s21   ;;  %s135_s25 = sadd.s32 1, %s1971_s20 }
   0x5   : > { %s132_s26 = ssub.s32 %s1975_s21, %s2049_s24  ;;  %p145_p0 = scmp.ne.s32.totalorder %s1971_s20, %s1967_s19 }
   0x6   : > { %p133_p1 = scmp.eq.s32.totalorder %s132_s26, 0  ;;  %p146_p2 = scmp.eq.s32.totalorder %s2045_s22, 1 }
   0x7   : > { %p151_p3 = scmp.ne.s32.totalorder %s1967_s19, %s1963_s18  ;;  %p152_p4 = scmp.eq.s32.totalorder %s1671_s23, 1 }
   0x8   : > { %s2060_s27 = scalar_select %p133_p1, %s1971_s20, %s135_s25  }
   0x9   : > { %p2062_p5 = por %p146_p2, %p145_p0  ;;  %p2066_p6 = por %p152_p4, %p151_p3 }
   0xa   : > { %p1674_p7 = scmp.ge.s32.totalorder %s1975_s21, 1  ;;  %p190_p8 = scmp.lt.s32.totalorder %s1975_s21, 3 }
   0xc   : > { %p191_p9 = pnand %p1674_p7, %p190_p8 }
   0xd   : > { %p218_p10 = scmp.lt.s32.totalorder (!%p191_p9), %s2045_s22, 1  ;;  %s1977_s7 = smov (!%p191_p9), 121  }
   0xe   : > { %194 = sbr.rel (%p191_p9) target bundleno = 1789 (0x6fd), region = 40  ;;  %s1983_s30 = smov (!%p191_p9), 127  }
   0xf   : > { %s1984_s6 = smov (!%p191_p9), 1   ;;  %s1989_s9 = smov (!%p191_p9), 2  }
  0x10   : > { %s215_s15 = sand.u32 (!%p191_p9), 1, %s1967_s19   ;;  %s1730_s17 = sshll.u32 (!%p191_p9), %s2045_s22, 4 }
  0x13   : > { %v2075_v0 = vld [vmem:[%s2609_s4] sm:$0xff]  ;;  %v2083_v1 = vld [vmem:[%s2609_s4 + $0x8] sm:$0xff]  ;;  %s219_s10 = scalar_select %p218_p10, %s2045_s22, 1  ;;  %v1978_v2 = vmov 0   ;;  %v2091_v3 = vld [vmem:[%s2609_s4 + $0x18] sm:$0xff]  ;;  %vm261_vm0 = vcmask 130048  }
  0x14   : > { %307 = vrot.lane.b32.xlu0 %v2075_v0, %s1977_s7  ;;  %1804 = vset.pattern.permute.xlu1 %v1978_v2  ;;  %v227_v6 = vld [vmem:[%s2606_s1] sm:$0xff]  ;;  %v2110_v7 = vld [vmem:[%s2609_s4 + $0x10] sm:$0xff]  ;;  %v1979_v8 = vmov 1   ;;  %v228_v9 = vld [vmem:[%s2606_s1 + $0x8] sm:$0xff]  ;;  %v546_v10 = vrot.slane %v2075_v0, 1  ;;  %v1980_v11 = vmov 2  }
  0x15   : > { %1803 = vset.pattern.permute.xlu0 %v1978_v2  ;;  %248 = vperm.xlu1 %1804, %v2083_v1   ;;  %s1729_s13 = sshll.u32 %s219_s10, 4  ;;  %v229_v12 = vld [vmem:[%s2606_s1 + $0x10] sm:$0xff]  ;;  %v230_v13 = vld [vmem:[%s2606_s1 + $0x18] sm:$0xff]  ;;  %v231_v14 = vld [vmem:[%s2607_s2] sm:$0xff]  ;;  %v1981_v25 = vmov 32.0  }
  0x16   : > { %1805 = vset.pattern.permute.xlu2 %v1978_v2  ;;  %s222_s16 = scalar_lea.vmem %s2605_s0, %s1729_s13  ;;  %v232_v15 = vld [vmem:[%s2607_s2 + $0x8] sm:$0xff]  ;;  %v233_v16 = vld [vmem:[%s2607_s2 + $0x10] sm:$0xff]  ;;  %v234_v17 = vld [vmem:[%s2607_s2 + $0x18] sm:$0xff]  ;;  %1899 = vrcp.f32 %v1981_v25  ;;  %s1933_s13 = scalar_lea.hbm %s2610_s5, 32 }
  0x17   : > { %258 = vperm.xlu2 %1805, %v2091_v3   ;;  %v2099_v4 = vld [vmem:[%s222_s16 + $0x8] sm:$0xff]  ;;  %v2101_v5 = vld [vmem:[%s222_s16] sm:$0xff]  ;;  %s1675_s16 = sshll.u32 %s215_s15, 4 }
  0x18   : > { %288 = vmatpush.msra.mxu0 %v2099_v4 }
  0x1a   : > { %289 = vmatpush.msra.mxu0 %v2101_v5 }
  0x1b   : > { %1678 = vmatmul.msk.f32.vlgmr.msra.gmra.mxu0 %vm261_vm0, %v227_v6 }
  0x1c   : > { %243 = vperm.xlu0 %1803, %v2075_v0   ;;  %v1900_v33 = vpop.eup %1899 }
  0x1d   : > { %253 = vperm.xlu1 %1804, %v2110_v7   ;;  %v330_v42 = vmul.f32 32.0, %v1900_v33  ;;  %vm334_vm5 = vweird.f32 %v1900_v33 }
  0x1f   : > { %1806 = vset.pattern.permute.xlu2 %v1979_v8  ;;  %v331_v47 = vsub.f32 1.0, %v330_v42 }
  0x20   : > { %371 = vperm.xlu2 %1806, %v2075_v0  }
  0x21   : > { %v332_v50 = vmul.f32 %v1900_v33, %v331_v47 }
  0x23   : > { %1679 = vmatmul.msk.f32.gmra.mxu0 %vm261_vm0, %v228_v9  ;;  %v333_v53 = vadd.f32 %v1900_v33, %v332_v50  ;;  %v1985_v50 = vmov 4  }
  0x24   : > { %1811 = vset.pattern.permute.xlu0 %v1980_v11 }
  0x25   : > { %403 = vperm.xlu0 %1811, %v2091_v3   ;;  %1807 = vset.pattern.permute.xlu1 %v1979_v8  ;;  %v2169_v56 = vsel %vm334_vm5, %v1900_v33, %v333_v53 }
  0x26   : > { %375 = vperm.xlu1 %1807, %v2083_v1  }
  0x28   : > { %547 = vrot.lane.b32.xlu2 %v546_v10, %s1977_s7 }
  0x29   : > { %1809 = vset.pattern.permute.xlu2 %v1980_v11 }
  0x2b   : > { %1680 = vmatmul.msk.f32.gmra.mxu0 %vm261_vm0, %v229_v12 }
  0x2d   : > { %1812 = vset.pattern.permute.xlu0 %v1979_v8 }
  0x2e   : > { %379 = vperm.xlu0 %1812, %v2110_v7   ;;  %1808 = vset.pattern.permute.xlu1 %v1980_v11 }
  0x2f   : > { %391 = vperm.xlu1 %1808, %v2075_v0  }
  0x30   : > { %395 = vperm.xlu2 %1809, %v2083_v1  }
  0x33   : > { %1681 = vmatmul.msk.f32.gmra.mxu0 %vm261_vm0, %v230_v13 }
  0x36   : > { %457 = vperm.xlu0 %1812, %v231_v14  }
  0x37   : > { %1810 = vset.pattern.permute.xlu1 %v1979_v8 }
  0x38   : > { %399 = vperm.xlu2 %1809, %v2110_v7   ;;  %383 = vperm.xlu1 %1810, %v2091_v3  }
  0x3e   : > { %1816 = vset.pattern.permute.xlu0 %v1978_v2 }
  0x3f   : > { %440 = vperm.xlu0 %1816, %v233_v16  }
  0x40   : > { %1814 = vset.pattern.permute.xlu2 %v1978_v2  ;;  %1813 = vset.pattern.permute.xlu1 %v1978_v2 }
  0x41   : > { %430 = vperm.xlu1 %1813, %v231_v14   ;;  %435 = vperm.xlu2 %1814, %v232_v15  }
  0x47   : > { %1821 = vset.pattern.permute.xlu0 %v1980_v11 }
  0x48   : > { %507 = vperm.xlu0 %1821, %v233_v16  }
  0x49   : > { %1815 = vset.pattern.permute.xlu1 %v1979_v8  ;;  %1817 = vset.pattern.permute.xlu2 %v1980_v11 }
  0x4a   : > { %461 = vperm.xlu1 %1815, %v232_v15   ;;  %499 = vperm.xlu2 %1817, %v231_v14  }
  0x52   : > { %465 = vperm.xlu1 %1815, %v233_v16   ;;  %1820 = vset.pattern.permute.xlu2 %v1979_v8 }
  0x53   : > { %469 = vperm.xlu2 %1820, %v234_v17  }
  0x5a   : > { %1818 = vset.pattern.permute.xlu1 %v1980_v11 }
  0x5b   : > { %503 = vperm.xlu1 %1818, %v232_v15   ;;  %1822 = vset.pattern.permute.xlu2 %v1980_v11  ;;  %v1982_v15 = vmov 3  }
  0x5c   : > { %511 = vperm.xlu2 %1822, %v234_v17   ;;  %1825 = vset.pattern.permute.xlu0 %v1982_v15 }
  0x63   : > { %1819 = vset.pattern.permute.xlu1 %v1978_v2 }
  0x64   : > { %445 = vperm.xlu1 %1819, %v234_v17   ;;  %1824 = vset.pattern.permute.xlu2 %v1982_v15 }
  0x6c   : > { %1823 = vset.pattern.permute.xlu1 %v1982_v15 }
  0x6d   : > { %523 = vperm.xlu1 %1823, %v2075_v0  }
  0x71   : > { %v259_v21 = vpop.permute.xlu2 %258 }
  0x7a   : > { %v2167_v24 = vpop.permute.xlu2 %371 }
  0x82   : > { %v548_v38 = vpop.permute.xlu2 %547 }
  0x86   : > { %v308_v18 = vpop.permute.xlu0 %307 }
  0x87   : > { %1735 = vpush %v308_v18  ;;  %v249_v22 = vpop.permute.xlu1 %248 }
  0x88   : > { %1737 = vpush %v548_v38 }
  0x8e   : > { %v244_v26 = vpop.permute.xlu0 %243 }
  0x8f   : > { %v254_v27 = vpop.permute.xlu1 %253 }
  0x98   : > { %v291_v19 = vpop.f32.mrf.mxu0 }
  0x99   : > { %v292_v29 = vadd.f32 %v291_v19, %v244_v26 }
  0x9b   : > { %vm303_vm1 = vcmp.ge.f32.partialorder %v292_v29, 0.0 }
  0xa0   : > { %v294_v20 = vpop.f32.mrf.mxu0 }
  0xa1   : > { %v295_v30 = vadd.f32 %v294_v20, %v249_v22 }
  0xa3   : > { %vm304_vm2 = vcmp.ge.f32.partialorder %v295_v30, 0.0 }
  0xa8   : > { %v297_v23 = vpop.f32.mrf.mxu0 }
  0xa9   : > { %v298_v31 = vadd.f32 %v297_v23, %v254_v27 }
  0xab   : > { %vm305_vm3 = vcmp.ge.f32.partialorder %v298_v31, 0.0 }
  0xb0   : > { %v300_v28 = vpop.f32.mrf.mxu0 }
  0xb1   : > { %v301_v32 = vadd.f32 %v300_v28, %v259_v21  ;;  %v404_v28 = vpop.permute.xlu0 %403 }
  0xb3   : > { %vm306_vm4 = vcmp.ge.f32.partialorder %v301_v32, 0.0 }
  0xb8   : > { %s1736_s26 = spop %1735 }
  0xb9   : > { %v310_v34 = vstv %s1736_s26  ;;  %v380_v38 = vpop.permute.xlu0 %379  ;;  %s1738_s8 = spop %1737  ;;  %s1605_s26 = scalar_lea.hbm %s2610_s5, %s1730_s17 }
  0xba   : > { %v312_v35 = vmul.f32 %v310_v34, %v292_v29  ;;  %v313_v36 = vmul.f32 %v310_v34, %v295_v30  ;;  %v314_v37 = vmul.f32 %v310_v34, %v298_v31  ;;  %v315_v39 = vmul.f32 %v310_v34, %v301_v32 }
  0xbc   : > { %v316_v40 = vsel %vm303_vm1, %v292_v29, %v312_v35  ;;  %v317_v41 = vsel %vm304_vm2, %v295_v30, %v313_v36  ;;  %v318_v44 = vsel %vm305_vm3, %v298_v31, %v314_v37  ;;  %v319_v46 = vsel %vm306_vm4, %v301_v32, %v315_v39  ;;  %v376_v30 = vpop.permute.xlu1 %375  ;;  %v396_v31 = vpop.permute.xlu2 %395 }
  0xbd   : > { %v320_v43 = vadd.f32 %v317_v41, %v316_v40  ;;  %vm643_vm3 = vcmask 261120  }
  0xbf   : > { %v321_v45 = vadd.f32 %v320_v43, %v318_v44 }
  0xc1   : > { %v322_v48 = vadd.f32 %v321_v45, %v319_v46 }
  0xc3   : > { %v323_v49 = vrot.slane %v322_v48, 4 }
  0xc4   : > { %v392_v42 = vpop.permute.xlu1 %391  ;;  %v400_v43 = vpop.permute.xlu2 %399 }
  0xc5   : > { %v324_v51 = vadd.f32 %v323_v49, %v322_v48 }
  0xc7   : > { %v325_v52 = vrot.slane %v324_v51, 2 }
  0xc9   : > { %v326_v54 = vadd.f32 %v325_v52, %v324_v51  ;;  %v1986_v51 = vmov 5  }
  0xcb   : > { %v327_v55 = vrot.slane %v326_v54, 1 }
  0xcc   : > { %v436_v52 = vpop.permute.xlu2 %435 }
  0xcd   : > { %v328_v57 = vadd.f32 %v327_v55, %v326_v54 }
  0xcf   : > { %v336_v58 = vmul.f32 %v2169_v56, %v328_v57 }
  0xd1   : > { %v338_v59 = vsub.f32 %v317_v41, %v336_v58  ;;  %v339_v60 = vsub.f32 %v318_v44, %v336_v58  ;;  %v337_v61 = vsub.f32 %v316_v40, %v336_v58  ;;  %v340_v62 = vsub.f32 %v319_v46, %v336_v58 }
  0xd3   : > { %v341_v63 = vmul.f32 %v337_v61, %v337_v61  ;;  %v342_v6 = vmul.f32 %v338_v59, %v338_v59  ;;  %v343_v9 = vmul.f32 %v339_v60, %v339_v60  ;;  %v344_v12 = vmul.f32 %v340_v62, %v340_v62 }
  0xd4   : > { %v500_v54 = vpop.permute.xlu2 %499 }
  0xd5   : > { %v345_v10 = vadd.f32 %v342_v6, %v341_v63  ;;  %v225_v63 = vlaneseq }
  0xd7   : > { %v346_v13 = vadd.f32 %v345_v10, %v343_v9  ;;  %v2215_v9 = vand.u32 127, %v225_v63 }
  0xd9   : > { %v347_v14 = vadd.f32 %v346_v13, %v344_v12  ;;  %v418_v13 = vadd.s32 4294967295, %v2215_v9 }
  0xdb   : > { %v348_v16 = vrot.slane %v347_v14, 4  ;;  %vm419_vm9 = vcmp.ge.s32.totalorder %v418_v13, 0 }
  0xdc   : > { %v2212_v57 = vpop.permute.xlu2 %469 }
  0xdd   : > { %v349_v17 = vadd.f32 %v348_v16, %v347_v14  ;;  %v488_v16 = vadd.s32 1, %v2215_v9 }
  0xdf   : > { %v350_v18 = vrot.slane %v349_v17, 2  ;;  %vm490_vm10 = vcmp.lt.s32.totalorder %v488_v16, 128 }
  0xe1   : > { %v351_v19 = vadd.f32 %v350_v18, %v349_v17 }
  0xe3   : > { %v352_v20 = vrot.slane %v351_v19, 1 }
  0xe4   : > { %v512_v58 = vpop.permute.xlu2 %511 }
  0xe5   : > { %v353_v21 = vadd.f32 %v352_v20, %v351_v19 }
  0xe7   : > { %v354_v22 = vmul.f32 %v353_v21, %v2169_v56 }
  0xe9   : > { %v355_v23 = vadd.f32 1e-05, %v354_v22 }
  0xeb   : > { %1901 = vrsqrt.f32 %v355_v23  ;;  %vm362_vm7 = vweird.f32 %v355_v23 }
  0xf1   : > { %v1902_v25 = vpop.eup %1901 }
  0xf2   : > { %v357_v26 = vmul.f32 %v1902_v25, %v355_v23  ;;  %vm363_vm6 = vweird.f32 %v1902_v25 }
  0xf3   : > { %vm364_vm8 = vmor %vm362_vm7, %vm363_vm6 }
  0xf4   : > { %v358_v27 = vmul.f32 %v1902_v25, %v357_v26 }
  0xf6   : > { %v359_v29 = vmul.f32 0.5, %v358_v27 }
  0xf8   : > { %v360_v32 = vsub.f32 1.5, %v359_v29 }
  0xfa   : > { %v361_v33 = vmul.f32 %v1902_v25, %v360_v32 }
  0xfc   : > { %v365_v34 = vsel %vm364_vm8, %v1902_v25, %v361_v33 }
  0xfd   : > { %v366_v35 = vmul.f32 %v365_v34, %v337_v61  ;;  %v367_v36 = vmul.f32 %v365_v34, %v338_v59  ;;  %v368_v37 = vmul.f32 %v365_v34, %v339_v60  ;;  %v369_v47 = vmul.f32 %v365_v34, %v340_v62 }
  0xff   : > { %v386_v39 = vmul.f32 %v2167_v24, %v366_v35  ;;  %v387_v40 = vmul.f32 %v376_v30, %v367_v36  ;;  %v388_v41 = vmul.f32 %v380_v38, %v368_v37  ;;  %v384_v24 = vpop.permute.xlu1 %383 }
 0x100   : > { %v389_v48 = vmul.f32 %v384_v24, %v369_v47 }
 0x101   : > { %v2178_v44 = vadd.f32 %v392_v42, %v386_v39  ;;  %v2180_v45 = vadd.f32 %v396_v31, %v387_v40  ;;  %v2182_v46 = vadd.f32 %v400_v43, %v388_v41 }
 0x102   : > { %v2190_v49 = vadd.f32 %v404_v28, %v389_v48 }
 0x103   : > { %484 = vrot.lane.b32.xlu0 %v2182_v46, %s1983_s30  ;;  %412 = vrot.lane.b32.xlu2 %v2180_v45, %s1984_s6 }
 0x104   : > { %410 = vrot.lane.b32.xlu1 %v2178_v44, %s1984_s6 }
 0x107   : > { %v431_v53 = vpop.permute.xlu1 %430 }
 0x10b   : > { %531 = vperm.xlu0 %1825, %v2110_v7   ;;  %414 = vrot.lane.b32.xlu2 %v2182_v46, %s1984_s6 }
 0x10c   : > { %480 = vrot.lane.b32.xlu1 %v2178_v44, %s1983_s30 }
 0x10f   : > { %v462_v55 = vpop.permute.xlu1 %461 }
 0x110   : > { %v473_v27 = vmul.f32 %v462_v55, %v2180_v45 }
 0x113   : > { %1829 = vset.pattern.permute.xlu0 %v1985_v50  ;;  %482 = vrot.lane.b32.xlu2 %v2180_v45, %s1983_s30 }
 0x114   : > { %486 = vrot.lane.b32.xlu1 %v2190_v49, %s1983_s30  ;;  %608 = vperm.xlu0 %1829, %v2083_v1   ;;  %s217_s30 = scalar_lea.vmem [#allocation2], %s1675_s16 }
 0x11b   : > { %416 = vrot.lane.b32.xlu2 %v2190_v49, %s1984_s6 }
 0x11c   : > { %535 = vperm.xlu1 %1823, %v2091_v3  }
 0x123   : > { %527 = vperm.xlu2 %1824, %v2083_v1  }
 0x124   : > { %1827 = vset.pattern.permute.xlu1 %v1985_v50 }
 0x125   : > { %612 = vperm.xlu1 %1827, %v2110_v7  }
 0x12b   : > { %1826 = vset.pattern.permute.xlu2 %v1985_v50 }
 0x12c   : > { %616 = vperm.xlu2 %1826, %v2091_v3  }
 0x12d   : > { %1830 = vset.pattern.permute.xlu1 %v1986_v51 }
 0x12e   : > { %632 = vperm.xlu1 %1830, %v2110_v7   ;;  %v466_v7 = vpop.permute.xlu1 %465 }
 0x12f   : > { %v474_v30 = vmul.f32 %v466_v7, %v2182_v46  ;;  %v550_v46 = vstv %s1738_s8  ;;  %s1988_s8 = smov 126  }
 0x134   : > { %1828 = vset.pattern.permute.xlu2 %v1986_v51 }
 0x135   : > { %636 = vperm.xlu2 %1828, %v2091_v3   ;;  %v458_v3 = vpop.permute.xlu0 %457 }
 0x136   : > { %628 = vperm.xlu1 %1830, %v2083_v1   ;;  %v504_v59 = vpop.permute.xlu1 %503  ;;  %v472_v34 = vmul.f32 %v458_v3, %v2178_v44 }
 0x13d   : > { %1831 = vset.pattern.permute.xlu2 %v1985_v50  ;;  %v441_v61 = vpop.permute.xlu0 %440 }
 0x13e   : > { %604 = vperm.xlu2 %1831, %v2075_v0   ;;  %v446_v62 = vpop.permute.xlu1 %445 }
 0x145   : > { %v508_v10 = vpop.permute.xlu0 %507 }
 0x146   : > { %1832 = vset.pattern.permute.xlu2 %v1986_v51  ;;  %v524_v12 = vpop.permute.xlu1 %523 }
 0x147   : > { %624 = vperm.xlu2 %1832, %v2075_v0  }
 0x14f   : > { %1836 = vset.pattern.permute.xlu2 %v1978_v2 }
 0x15d   : > { %v413_v60 = vpop.permute.xlu2 %412 }
 0x15e   : > { %v425_v17 = vsel %vm419_vm9, %v413_v60, 0.0 }
 0x15f   : > { %v449_v23 = vmul.f32 %v436_v52, %v425_v17 }
 0x161   : > { %v477_v31 = vadd.f32 %v473_v27, %v449_v23 }
 0x165   : > { %v415_v6 = vpop.permute.xlu2 %414 }
 0x166   : > { %v426_v21 = vsel %vm419_vm9, %v415_v6, 0.0 }
 0x167   : > { %v450_v28 = vmul.f32 %v441_v61, %v426_v21 }
 0x169   : > { %v478_v35 = vadd.f32 %v474_v30, %v450_v28 }
 0x16d   : > { %v483_v14 = vpop.permute.xlu2 %482 }
 0x16e   : > { %v495_v22 = vsel %vm490_vm10, %v483_v14, 0.0 }
 0x16f   : > { %v515_v29 = vmul.f32 %v504_v59, %v495_v22 }
 0x171   : > { %v519_v37 = vadd.f32 %v515_v29, %v477_v31 }
 0x175   : > { %v485_v18 = vpop.permute.xlu0 %484  ;;  %v417_v19 = vpop.permute.xlu2 %416 }
 0x176   : > { %v411_v20 = vpop.permute.xlu1 %410  ;;  %v496_v25 = vsel %vm490_vm10, %v485_v18, 0.0  ;;  %v427_v48 = vsel %vm419_vm9, %v417_v19, 0.0 }
 0x177   : > { %v424_v26 = vsel %vm419_vm9, %v411_v20, 0.0  ;;  %v516_v32 = vmul.f32 %v508_v10, %v496_v25  ;;  %v451_v59 = vmul.f32 %v446_v62, %v427_v48 }
 0x178   : > { %v448_v33 = vmul.f32 %v431_v53, %v424_v26 }
 0x179   : > { %v520_v42 = vadd.f32 %v516_v32, %v478_v35 }
 0x17a   : > { %v476_v41 = vadd.f32 %v472_v34, %v448_v33 }
 0x17d   : > { %v528_v36 = vpop.permute.xlu2 %527  ;;  %v532_v39 = vpop.permute.xlu0 %531 }
 0x17e   : > { %v481_v38 = vpop.permute.xlu1 %480  ;;  %v539_v43 = vadd.f32 %v528_v36, %v519_v37  ;;  %v540_v47 = vadd.f32 %v532_v39, %v520_v42 }
 0x17f   : > { %v494_v40 = vsel %vm490_vm10, %v481_v38, 0.0 }
 0x180   : > { %v514_v45 = vmul.f32 %v500_v54, %v494_v40  ;;  %v553_v52 = vmul.f32 %v550_v46, %v539_v43  ;;  %vm543_vm11 = vcmp.ge.f32.partialorder %v539_v43, 0.0  ;;  %v554_v44 = vmul.f32 %v550_v46, %v540_v47 }
 0x181   : > { %vm544_vm13 = vcmp.ge.f32.partialorder %v540_v47, 0.0  ;;  %v475_v54 = vmul.f32 %v2212_v57, %v2190_v49 }
 0x182   : > { %v518_v24 = vadd.f32 %v514_v45, %v476_v41  ;;  %v557_v60 = vsel %vm543_vm11, %v539_v43, %v553_v52  ;;  %v558_v10 = vsel %vm544_vm13, %v540_v47, %v554_v44  ;;  %v1987_v47 = vmov 6  }
 0x183   : > { %v479_v13 = vadd.f32 %v475_v54, %v451_v59  ;;  %1833 = vset.pattern.permute.xlu0 %v1987_v47  ;;  %1834 = vset.pattern.permute.xlu1 %v1987_v47 }
 0x184   : > { %v538_v53 = vadd.f32 %v524_v12, %v518_v24  ;;  %680 = vperm.xlu0 %1833, %v2083_v1   ;;  %676 = vperm.xlu1 %1834, %v2075_v0  }
 0x186   : > { %vm542_vm12 = vcmp.ge.f32.partialorder %v538_v53, 0.0  ;;  %v552_v55 = vmul.f32 %v550_v46, %v538_v53  ;;  %v487_v7 = vpop.permute.xlu1 %486  ;;  %v617_v42 = vpop.permute.xlu2 %616 }
 0x187   : > { %v497_v3 = vsel %vm490_vm10, %v487_v7, 0.0 }
 0x188   : > { %v556_v61 = vsel %vm542_vm12, %v538_v53, %v552_v55  ;;  %v517_v63 = vmul.f32 %v512_v58, %v497_v3 }
 0x189   : > { %v560_v6 = vadd.f32 %v557_v60, %v556_v61 }
 0x18a   : > { %v521_v12 = vadd.f32 %v517_v63, %v479_v13  ;;  %v609_v63 = vpop.permute.xlu0 %608 }
 0x18b   : > { %v561_v14 = vadd.f32 %v560_v6, %v558_v10 }
 0x18c   : > { %1835 = vset.pattern.permute.xlu1 %v1978_v2  ;;  %1837 = vset.pattern.permute.xlu0 %v1978_v2 }
 0x18e   : > { %v536_v17 = vpop.permute.xlu1 %535 }
 0x18f   : > { %v541_v18 = vadd.f32 %v536_v17, %v521_v12  ;;  %v637_v24 = vpop.permute.xlu2 %636 }
 0x191   : > { %vm545_vm14 = vcmp.ge.f32.partialorder %v541_v18, 0.0  ;;  %v555_v19 = vmul.f32 %v550_v46, %v541_v18 }
 0x193   : > { %v559_v20 = vsel %vm545_vm14, %v541_v18, %v555_v19 }
 0x194   : > { %v562_v62 = vadd.f32 %v561_v14, %v559_v20 }
 0x196   : > { %v563_v21 = vrot.slane %v562_v62, 4 }
 0x197   : > { %v613_v46 = vpop.permute.xlu1 %612 }
 0x198   : > { %v564_v16 = vadd.f32 %v563_v21, %v562_v62  ;;  %v605_v59 = vpop.permute.xlu2 %604  ;;  %v236_v21 = vld [vmem:[%s2608_s3 + $0x8] sm:$0xff] }
 0x19a   : > { %v565_v22 = vrot.slane %v564_v16, 2 }
 0x19c   : > { %v566_v23 = vadd.f32 %v565_v22, %v564_v16  ;;  %v235_v16 = vld [vmem:[%s2608_s3] sm:$0xff] }
 0x19d   : > { %v2251_v22 = vld [vmem:[%s2609_s4 + $0x20] sm:$0xff] }
 0x19e   : > { %v567_v25 = vrot.slane %v566_v23, 1  ;;  %768 = vrot.lane.b32.xlu2 %v2251_v22, %s1977_s7  ;;  %705 = vperm.xlu1 %1835, %v2251_v22  }
 0x1a0   : > { %v568_v26 = vadd.f32 %v567_v25, %v566_v23  ;;  %v633_v3 = vpop.permute.xlu1 %632 }
 0x1a1   : > { %v625_v18 = vpop.permute.xlu2 %624 }
 0x1a2   : > { %v569_v49 = vmul.f32 %v568_v26, %v2169_v56 }
 0x1a4   : > { %v570_v57 = vsub.f32 %v556_v61, %v569_v49  ;;  %v571_v58 = vsub.f32 %v557_v60, %v569_v49  ;;  %v572_v27 = vsub.f32 %v558_v10, %v569_v49  ;;  %v573_v28 = vsub.f32 %v559_v20, %v569_v49 }
 0x1a6   : > { %v574_v29 = vmul.f32 %v570_v57, %v570_v57  ;;  %v575_v30 = vmul.f32 %v571_v58, %v571_v58  ;;  %v576_v31 = vmul.f32 %v572_v27, %v572_v27  ;;  %v577_v33 = vmul.f32 %v573_v28, %v573_v28 }
 0x1a8   : > { %v578_v32 = vadd.f32 %v575_v30, %v574_v29  ;;  %v629_v19 = vpop.permute.xlu1 %628 }
 0x1aa   : > { %v579_v34 = vadd.f32 %v578_v32, %v576_v31  ;;  %v1684_v32 = vld [vmem:[%s2606_s1 + $0x20] sm:$0xff] }
 0x1ac   : > { %v580_v35 = vadd.f32 %v579_v34, %v577_v33  ;;  %v1686_v33 = vld [vmem:[%s2606_s1 + $0x30] sm:$0xff]  ;;  %v1688_v34 = vld [vmem:[%s2607_s2 + $0x20] sm:$0xff] }
 0x1ae   : > { %v581_v36 = vrot.slane %v580_v35, 4 }
 0x1b0   : > { %v582_v37 = vadd.f32 %v581_v36, %v580_v35  ;;  %v1687_v35 = vld [vmem:[%s2606_s1 + $0x38] sm:$0xff]  ;;  %v1690_v36 = vld [vmem:[%s2607_s2 + $0x30] sm:$0xff] }
 0x1b2   : > { %v583_v38 = vrot.slane %v582_v37, 2 }
 0x1b4   : > { %v584_v39 = vadd.f32 %v583_v38, %v582_v37  ;;  %v1689_v37 = vld [vmem:[%s2607_s2 + $0x28] sm:$0xff] }
 0x1b6   : > { %v585_v40 = vrot.slane %v584_v39, 1 }
 0x1b8   : > { %v586_v41 = vadd.f32 %v585_v40, %v584_v39  ;;  %v1691_v39 = vld [vmem:[%s2607_s2 + $0x38] sm:$0xff] }
 0x1ba   : > { %v587_v43 = vmul.f32 %v586_v41, %v2169_v56 }
 0x1bc   : > { %v588_v45 = vadd.f32 1e-05, %v587_v43 }
 0x1be   : > { %1903 = vrsqrt.f32 %v588_v45  ;;  %vm595_vm1 = vweird.f32 %v588_v45 }
 0x1c4   : > { %v1904_v48 = vpop.eup %1903 }
 0x1c5   : > { %v590_v52 = vmul.f32 %v1904_v48, %v588_v45  ;;  %vm596_vm15 = vweird.f32 %v1904_v48 }
 0x1c6   : > { %vm597_vm2 = vmor %vm595_vm1, %vm596_vm15 }
 0x1c7   : > { %v591_v53 = vmul.f32 %v1904_v48, %v590_v52 }
 0x1c9   : > { %v592_v44 = vmul.f32 0.5, %v591_v53 }
 0x1cb   : > { %v593_v55 = vsub.f32 1.5, %v592_v44 }
 0x1cd   : > { %v594_v7 = vmul.f32 %v1904_v48, %v593_v55 }
 0x1cf   : > { %v598_v1 = vsel %vm597_vm2, %v1904_v48, %v594_v7 }
 0x1d0   : > { %v602_v60 = vmul.f32 %v598_v1, %v573_v28  ;;  %v601_v0 = vmul.f32 %v598_v1, %v572_v27  ;;  %v599_v61 = vmul.f32 %v598_v1, %v570_v57  ;;  %v600_v54 = vmul.f32 %v598_v1, %v571_v58  ;;  %v2259_v57 = vld [vmem:[%s2609_s4 + $0x30] sm:$0xff]  ;;  %v2264_v58 = vld [vmem:[%s2609_s4 + $0x38] sm:$0xff]  ;;  %v2269_v27 = vld [vmem:[%s2609_s4 + $0x28] sm:$0xff] }
 0x1d1   : > { %715 = vperm.xlu0 %1837, %v2259_v57   ;;  %720 = vperm.xlu1 %1835, %v2264_v58  }
 0x1d2   : > { %v622_v6 = vmul.f32 %v617_v42, %v602_v60  ;;  %v621_v10 = vmul.f32 %v613_v46, %v601_v0  ;;  %v620_v14 = vmul.f32 %v609_v63, %v600_v54  ;;  %v619_v12 = vmul.f32 %v605_v59, %v599_v61  ;;  %710 = vperm.xlu2 %1836, %v2269_v27  }
 0x1d4   : > { %v642_v13 = vadd.f32 %v637_v24, %v622_v6  ;;  %v641_v17 = vadd.f32 %v633_v3, %v621_v10  ;;  %v640_v20 = vadd.f32 %v629_v19, %v620_v14  ;;  %v639_v62 = vadd.f32 %v625_v18, %v619_v12 }
 0x1d6   : > { %662 = vmatpush.msrb.mxu0 %v642_v13  ;;  %1731 = vmatpush.msra.mxu1 %v642_v13 }
 0x1d8   : > { %663 = vmatpush.msrb.mxu0 %v641_v17  ;;  %1732 = vmatpush.msra.mxu1 %v641_v17 }
 0x1d9   : > { %1839 = vset.pattern.permute.xlu1 %v1979_v8  ;;  %1843 = vset.pattern.permute.xlu0 %v1980_v11 }
 0x1da   : > { %664 = vmatpush.msrb.mxu0 %v640_v20  ;;  %1733 = vmatpush.msra.mxu1 %v640_v20 }
 0x1db   : > { %829 = vperm.xlu1 %1839, %v2269_v27   ;;  %1838 = vset.pattern.permute.xlu2 %v1979_v8 }
 0x1dc   : > { %665 = vmatpush.msrb.mxu0 %v639_v62  ;;  %1734 = vmatpush.msra.mxu1 %v639_v62 }
 0x1dd   : > { %1683 = vmatmul.msk.f32.vlgmr.msra.gmra.mxu1 %vm643_vm3, %v236_v21  ;;  %1682 = vmatmul.msk.f32.vlgmr.msrb.gmra.mxu0 %vm643_vm3, %v235_v16 }
 0x1de   : > { %825 = vperm.xlu2 %1838, %v2251_v22   ;;  %857 = vperm.xlu0 %1843, %v2264_v58  }
 0x1e3   : > { %1840 = vset.pattern.permute.xlu1 %v1980_v11 }
 0x1e4   : > { %845 = vperm.xlu1 %1840, %v2251_v22  }
 0x1e6   : > { %1841 = vset.pattern.permute.xlu2 %v1980_v11  ;;  %1844 = vset.pattern.permute.xlu0 %v1979_v8 }
 0x1e7   : > { %833 = vperm.xlu0 %1844, %v2259_v57  }
 0x1ec   : > { %1842 = vset.pattern.permute.xlu1 %v1979_v8 }
 0x1ed   : > { %837 = vperm.xlu1 %1842, %v2264_v58  }
 0x1ef   : > { %911 = vperm.xlu0 %1844, %v1688_v34  }
 0x1f5   : > { %1845 = vset.pattern.permute.xlu1 %v1978_v2 }
 0x1f6   : > { %v681_v23 = vpop.permute.xlu0 %680  ;;  %v677_v25 = vpop.permute.xlu1 %676  ;;  %884 = vperm.xlu1 %1845, %v1688_v34  }
 0x1f7   : > { %1848 = vset.pattern.permute.xlu0 %v1978_v2 }
 0x1f8   : > { %894 = vperm.xlu0 %1848, %v1690_v36   ;;  %v769_v38 = vpop.permute.xlu2 %768 }
 0x1f9   : > { %1739 = vpush %v769_v38 }
 0x1fe   : > { %1847 = vset.pattern.permute.xlu1 %v1979_v8 }
 0x1ff   : > { %915 = vperm.xlu1 %1847, %v1689_v37  }
 0x200   : > { %1853 = vset.pattern.permute.xlu0 %v1980_v11 }
 0x201   : > { %961 = vperm.xlu0 %1853, %v1690_v36  }
 0x207   : > { %919 = vperm.xlu1 %1847, %v1690_v36  }
 0x209   : > { %1857 = vset.pattern.permute.xlu0 %v1982_v15 }
 0x20f   : > { %1850 = vset.pattern.permute.xlu1 %v1980_v11 }
 0x210   : > { %957 = vperm.xlu1 %1850, %v1689_v37   ;;  %v706_v43 = vpop.permute.xlu1 %705 }
 0x218   : > { %1851 = vset.pattern.permute.xlu1 %v1978_v2 }
 0x219   : > { %899 = vperm.xlu1 %1851, %v1691_v39  }
 0x221   : > { %1855 = vset.pattern.permute.xlu1 %v1982_v15 }
 0x222   : > { %977 = vperm.xlu1 %1855, %v2251_v22  }
 0x22a   : > { %s1740_s6 = spop %1739 }
 0x22b   : > { %v771_v44 = vstv %s1740_s6  ;;  %s1606_s6 = sshll.u32 %s217_s30, 4  ;;  %s1607_s6 = int_to_ptr.vmem [resolvable:$true] %s1606_s6 }
 0x22c   : > { %v711_v41 = vpop.permute.xlu2 %710 }
 0x238   : > { %v2341_v46 = vpop.permute.xlu2 %825 }
 0x243   : > { %v716_v45 = vpop.permute.xlu0 %715  ;;  %v721_v60 = vpop.permute.xlu1 %720 }
 0x25a   : > { %v670_v26 = vpop.f32.mrf.mxu1  ;;  %v667_v49 = vpop.f32.mrf.mxu0 }
 0x25b   : > { %v674_v28 = vadd.f32 %v670_v26, %v2099_v4  ;;  %v673_v29 = vadd.f32 %v667_v49, %v2101_v5  ;;  %v1685_v4 = vld [vmem:[%s2606_s1 + $0x28] sm:$0xff]  ;;  %v1000_v5 = vrot.slane %v2251_v22, 1 }
 0x25d   : > { %v2276_v30 = vadd.f32 %v681_v23, %v674_v28  ;;  %v2278_v31 = vadd.f32 %v677_v25, %v673_v29  ;;  %1001 = vrot.lane.b32.xlu2 %v1000_v5, %s1977_s7 }
 0x25f   : > { %749 = vmatpush.msra.mxu2 %v2276_v30 }
 0x261   : > { %750 = vmatpush.msra.mxu2 %v2278_v31 }
 0x262   : > { %1698 = vmatmul.msk.f32.vlgmr.msra.gmra.mxu2 %vm261_vm0, %v1684_v32 }
 0x265   : > { %849 = vperm.xlu2 %1841, %v2269_v27  }
 0x26a   : > { %1699 = vmatmul.msk.f32.gmra.mxu2 %vm261_vm0, %v1685_v4 }
 0x26d   : > { %853 = vperm.xlu2 %1841, %v2259_v57  }
 0x272   : > { %1700 = vmatmul.msk.f32.gmra.mxu2 %vm261_vm0, %v1686_v33 }
 0x275   : > { %1846 = vset.pattern.permute.xlu2 %v1978_v2 }
 0x276   : > { %889 = vperm.xlu2 %1846, %v1689_v37  }
 0x27a   : > { %1701 = vmatmul.msk.f32.gmra.mxu2 %vm261_vm0, %v1687_v35 }
 0x27e   : > { %1849 = vset.pattern.permute.xlu2 %v1980_v11 }
 0x27f   : > { %953 = vperm.xlu2 %1849, %v1688_v34  }
 0x287   : > { %1852 = vset.pattern.permute.xlu2 %v1979_v8 }
 0x288   : > { %923 = vperm.xlu2 %1852, %v1691_v39  }
 0x290   : > { %1854 = vset.pattern.permute.xlu2 %v1980_v11 }
 0x291   : > { %965 = vperm.xlu2 %1854, %v1691_v39  }
 0x299   : > { %1856 = vset.pattern.permute.xlu2 %v1982_v15 }
 0x2b7   : > { %v1002_v1 = vpop.permute.xlu2 %1001 }
 0x2b8   : > { %1741 = vpush %v1002_v1 }
 0x2e5   : > { %v752_v40 = vpop.f32.mrf.mxu2 }
 0x2e6   : > { %v753_v52 = vadd.f32 %v752_v40, %v706_v43 }
 0x2e8   : > { %v773_v7 = vmul.f32 %v771_v44, %v753_v52  ;;  %vm764_vm5 = vcmp.ge.f32.partialorder %v753_v52, 0.0 }
 0x2e9   : > { %s1742_s10 = spop %1741 }
 0x2ea   : > { %v777_v61 = vsel %vm764_vm5, %v753_v52, %v773_v7 }
 0x2ed   : > { %v755_v42 = vpop.f32.mrf.mxu2 }
 0x2ee   : > { %v756_v24 = vadd.f32 %v755_v42, %v711_v41 }
 0x2f0   : > { %v774_v55 = vmul.f32 %v771_v44, %v756_v24  ;;  %vm765_vm4 = vcmp.ge.f32.partialorder %v756_v24, 0.0 }
 0x2f2   : > { %v778_v3 = vsel %vm765_vm4, %v756_v24, %v774_v55 }
 0x2f3   : > { %v781_v6 = vadd.f32 %v778_v3, %v777_v61 }
 0x2f5   : > { %v758_v48 = vpop.f32.mrf.mxu2 }
 0x2f6   : > { %v759_v53 = vadd.f32 %v758_v48, %v716_v45  ;;  %v858_v48 = vpop.permute.xlu0 %857 }
 0x2f8   : > { %v775_v59 = vmul.f32 %v771_v44, %v759_v53  ;;  %vm766_vm6 = vcmp.ge.f32.partialorder %v759_v53, 0.0 }
 0x2fa   : > { %v779_v54 = vsel %vm766_vm6, %v759_v53, %v775_v59  ;;  %v830_v53 = vpop.permute.xlu1 %829 }
 0x2fb   : > { %v782_v13 = vadd.f32 %v781_v6, %v779_v54 }
 0x2fd   : > { %v761_v0 = vpop.f32.mrf.mxu2 }
 0x2fe   : > { %v762_v63 = vadd.f32 %v761_v0, %v721_v60  ;;  %v834_v0 = vpop.permute.xlu0 %833 }
 0x300   : > { %vm767_vm7 = vcmp.ge.f32.partialorder %v762_v63, 0.0  ;;  %v776_v10 = vmul.f32 %v771_v44, %v762_v63  ;;  %v850_v44 = vpop.permute.xlu2 %849 }
 0x302   : > { %v780_v14 = vsel %vm767_vm7, %v762_v63, %v776_v10  ;;  %v846_v6 = vpop.permute.xlu1 %845 }
 0x303   : > { %v783_v12 = vadd.f32 %v782_v13, %v780_v14 }
 0x305   : > { %v784_v17 = vrot.slane %v783_v12, 4 }
 0x307   : > { %v785_v18 = vadd.f32 %v784_v17, %v783_v12 }
 0x308   : > { %v854_v10 = vpop.permute.xlu2 %853 }
 0x309   : > { %v786_v19 = vrot.slane %v785_v18, 2 }
 0x30b   : > { %v787_v20 = vadd.f32 %v786_v19, %v785_v18 }
 0x30d   : > { %v788_v62 = vrot.slane %v787_v20, 1 }
 0x30f   : > { %v789_v21 = vadd.f32 %v788_v62, %v787_v20 }
 0x310   : > { %v890_v20 = vpop.permute.xlu2 %889 }
 0x311   : > { %v790_v16 = vmul.f32 %v789_v21, %v2169_v56 }
 0x313   : > { %v792_v23 = vsub.f32 %v778_v3, %v790_v16  ;;  %v791_v25 = vsub.f32 %v777_v61, %v790_v16  ;;  %v793_v26 = vsub.f32 %v779_v54, %v790_v16  ;;  %v794_v49 = vsub.f32 %v780_v14, %v790_v16 }
 0x315   : > { %v795_v28 = vmul.f32 %v791_v25, %v791_v25  ;;  %v796_v29 = vmul.f32 %v792_v23, %v792_v23  ;;  %v797_v32 = vmul.f32 %v793_v26, %v793_v26  ;;  %v798_v5 = vmul.f32 %v794_v49, %v794_v49 }
 0x317   : > { %v799_v4 = vadd.f32 %v796_v29, %v795_v28 }
 0x318   : > { %v954_v21 = vpop.permute.xlu2 %953 }
 0x319   : > { %v800_v33 = vadd.f32 %v799_v4, %v797_v32 }
 0x31b   : > { %v801_v34 = vadd.f32 %v800_v33, %v798_v5  ;;  %v872_v5 = vadd.s32 4294967294, %v2215_v9 }
 0x31d   : > { %v802_v35 = vrot.slane %v801_v34, 4  ;;  %vm873_vm11 = vcmp.ge.s32.totalorder %v872_v5, 0 }
 0x31f   : > { %v803_v36 = vadd.f32 %v802_v35, %v801_v34  ;;  %v942_v34 = vadd.s32 2, %v2215_v9 }
 0x321   : > { %v804_v37 = vrot.slane %v803_v36, 2  ;;  %vm944_vm12 = vcmp.lt.s32.totalorder %v942_v34, 128 }
 0x323   : > { %v805_v38 = vadd.f32 %v804_v37, %v803_v36 }
 0x325   : > { %v806_v39 = vrot.slane %v805_v38, 1 }
 0x327   : > { %v807_v40 = vadd.f32 %v806_v39, %v805_v38 }
 0x329   : > { %v808_v41 = vmul.f32 %v807_v40, %v2169_v56 }
 0x32b   : > { %v809_v42 = vadd.f32 1e-05, %v808_v41 }
 0x32d   : > { %1905 = vrsqrt.f32 %v809_v42  ;;  %vm816_vm9 = vweird.f32 %v809_v42 }
 0x333   : > { %v1906_v43 = vpop.eup %1905 }
 0x334   : > { %v811_v45 = vmul.f32 %v1906_v43, %v809_v42  ;;  %vm817_vm8 = vweird.f32 %v1906_v43 }
 0x335   : > { %vm818_vm10 = vmor %vm816_vm9, %vm817_vm8 }
 0x336   : > { %v812_v24 = vmul.f32 %v1906_v43, %v811_v45 }
 0x338   : > { %v813_v52 = vmul.f32 0.5, %v812_v24 }
 0x33a   : > { %v814_v55 = vsub.f32 1.5, %v813_v52 }
 0x33c   : > { %v815_v7 = vmul.f32 %v1906_v43, %v814_v55 }
 0x33e   : > { %v819_v59 = vsel %vm818_vm10, %v1906_v43, %v815_v7 }
 0x33f   : > { %v820_v3 = vmul.f32 %v819_v59, %v791_v25  ;;  %v821_v1 = vmul.f32 %v819_v59, %v792_v23  ;;  %v822_v60 = vmul.f32 %v819_v59, %v793_v26  ;;  %v823_v17 = vmul.f32 %v819_v59, %v794_v49  ;;  %v912_v25 = vpop.permute.xlu0 %911 }
 0x341   : > { %v840_v61 = vmul.f32 %v2341_v46, %v820_v3  ;;  %v841_v54 = vmul.f32 %v830_v53, %v821_v1  ;;  %v842_v63 = vmul.f32 %v834_v0, %v822_v60  ;;  %v838_v46 = vpop.permute.xlu1 %837 }
 0x342   : > { %v843_v18 = vmul.f32 %v838_v46, %v823_v17 }
 0x343   : > { %v2346_v13 = vadd.f32 %v850_v44, %v841_v54  ;;  %v2348_v14 = vadd.f32 %v846_v6, %v840_v61  ;;  %v2350_v12 = vadd.f32 %v854_v10, %v842_v63 }
 0x344   : > { %v2358_v19 = vadd.f32 %v858_v48, %v843_v18 }
 0x345   : > { %938 = vrot.lane.b32.xlu0 %v2350_v12, %s1988_s8  ;;  %866 = vrot.lane.b32.xlu2 %v2346_v13, %s1989_s9  ;;  %v926_v55 = vmul.f32 %v912_v25, %v2348_v14 }
 0x346   : > { %864 = vrot.lane.b32.xlu1 %v2348_v14, %s1989_s9 }
 0x347   : > { %v895_v49 = vpop.permute.xlu0 %894 }
 0x349   : > { %v885_v62 = vpop.permute.xlu1 %884 }
 0x34d   : > { %985 = vperm.xlu0 %1857, %v2259_v57   ;;  %868 = vrot.lane.b32.xlu2 %v2350_v12, %s1989_s9 }
 0x34e   : > { %934 = vrot.lane.b32.xlu1 %v2348_v14, %s1988_s8 }
 0x34f   : > { %v962_v32 = vpop.permute.xlu0 %961 }
 0x351   : > { %v916_v16 = vpop.permute.xlu1 %915 }
 0x352   : > { %v927_v43 = vmul.f32 %v916_v16, %v2346_v13 }
 0x355   : > { %1861 = vset.pattern.permute.xlu0 %v1985_v50  ;;  %936 = vrot.lane.b32.xlu2 %v2346_v13, %s1988_s8 }
 0x356   : > { %940 = vrot.lane.b32.xlu1 %v2358_v19, %s1988_s8  ;;  %1062 = vperm.xlu0 %1861, %v2269_v27  }
 0x35d   : > { %870 = vrot.lane.b32.xlu2 %v2358_v19, %s1989_s9  ;;  %s1990_s9 = smov 124  }
 0x35e   : > { %989 = vperm.xlu1 %1855, %v2264_v58   ;;  %1865 = vset.pattern.permute.xlu0 %v1987_v47 }
 0x35f   : > { %1133 = vperm.xlu0 %1865, %v2269_v27  }
 0x365   : > { %981 = vperm.xlu2 %1856, %v2269_v27  }
 0x366   : > { %1859 = vset.pattern.permute.xlu1 %v1985_v50 }
 0x367   : > { %1066 = vperm.xlu1 %1859, %v2259_v57   ;;  %1869 = vset.pattern.permute.xlu0 %v1978_v2 }
 0x36d   : > { %1858 = vset.pattern.permute.xlu2 %v1985_v50 }
 0x36e   : > { %1070 = vperm.xlu2 %1858, %v2264_v58  }
 0x36f   : > { %1862 = vset.pattern.permute.xlu1 %v1986_v51 }
 0x370   : > { %1086 = vperm.xlu1 %1862, %v2259_v57   ;;  %v924_v57 = vpop.permute.xlu2 %923 }
 0x376   : > { %1860 = vset.pattern.permute.xlu2 %v1986_v51 }
 0x377   : > { %1090 = vperm.xlu2 %1860, %v2264_v58   ;;  %v920_v58 = vpop.permute.xlu1 %919 }
 0x378   : > { %1082 = vperm.xlu1 %1862, %v2269_v27   ;;  %v966_v27 = vpop.permute.xlu2 %965  ;;  %v928_v48 = vmul.f32 %v920_v58, %v2350_v12  ;;  %v1004_v12 = vstv %s1742_s10  ;;  %s1991_s10 = smov 4  }
 0x37f   : > { %1863 = vset.pattern.permute.xlu2 %v1985_v50  ;;  %v958_v23 = vpop.permute.xlu1 %957 }
 0x380   : > { %1866 = vset.pattern.permute.xlu1 %v1987_v47  ;;  %1058 = vperm.xlu2 %1863, %v2251_v22  }
 0x381   : > { %1129 = vperm.xlu1 %1866, %v2251_v22  }
 0x387   : > { %v900_v28 = vpop.permute.xlu1 %899 }
 0x388   : > { %1864 = vset.pattern.permute.xlu2 %v1986_v51 }
 0x389   : > { %1867 = vset.pattern.permute.xlu1 %v1978_v2  ;;  %1078 = vperm.xlu2 %1864, %v2251_v22  }
 0x38f   : > { %v978_v4 = vpop.permute.xlu1 %977 }
 0x391   : > { %1868 = vset.pattern.permute.xlu2 %v1978_v2 }
 0x39f   : > { %v867_v26 = vpop.permute.xlu2 %866 }
 0x3a0   : > { %v879_v22 = vsel %vm873_vm11, %v867_v26, 0.0 }
 0x3a1   : > { %v903_v40 = vmul.f32 %v890_v20, %v879_v22 }
 0x3a3   : > { %v931_v52 = vadd.f32 %v927_v43, %v903_v40 }
 0x3a7   : > { %v869_v29 = vpop.permute.xlu2 %868 }
 0x3a8   : > { %v880_v38 = vsel %vm873_vm11, %v869_v29, 0.0 }
 0x3a9   : > { %v904_v45 = vmul.f32 %v895_v49, %v880_v38 }
 0x3ab   : > { %v932_v7 = vadd.f32 %v928_v48, %v904_v45 }
 0x3af   : > { %v937_v33 = vpop.permute.xlu2 %936 }
 0x3b0   : > { %v949_v39 = vsel %vm944_vm12, %v937_v33, 0.0 }
 0x3b1   : > { %v969_v24 = vmul.f32 %v958_v23, %v949_v39 }
 0x3b3   : > { %v973_v3 = vadd.f32 %v969_v24, %v931_v52 }
 0x3b7   : > { %v939_v35 = vpop.permute.xlu0 %938  ;;  %v871_v36 = vpop.permute.xlu2 %870 }
 0x3b8   : > { %v865_v37 = vpop.permute.xlu1 %864  ;;  %v950_v41 = vsel %vm944_vm12, %v939_v35, 0.0  ;;  %v881_v17 = vsel %vm873_vm11, %v871_v36, 0.0 }
 0x3b9   : > { %v878_v42 = vsel %vm873_vm11, %v865_v37, 0.0  ;;  %v970_v53 = vmul.f32 %v962_v32, %v950_v41  ;;  %v905_v16 = vmul.f32 %v900_v28, %v881_v17 }
 0x3ba   : > { %v902_v44 = vmul.f32 %v885_v62, %v878_v42 }
 0x3bb   : > { %v974_v54 = vadd.f32 %v970_v53, %v932_v7 }
 0x3bc   : > { %v930_v61 = vadd.f32 %v926_v55, %v902_v44 }
 0x3bf   : > { %v982_v59 = vpop.permute.xlu2 %981  ;;  %v986_v60 = vpop.permute.xlu0 %985 }
 0x3c0   : > { %v935_v1 = vpop.permute.xlu1 %934  ;;  %v993_v63 = vadd.f32 %v982_v59, %v973_v3  ;;  %v994_v10 = vadd.f32 %v986_v60, %v974_v54 }
 0x3c1   : > { %v948_v0 = vsel %vm944_vm12, %v935_v1, 0.0 }
 0x3c2   : > { %v968_v6 = vmul.f32 %v954_v21, %v948_v0  ;;  %v1007_v46 = vmul.f32 %v1004_v12, %v993_v63  ;;  %vm997_vm13 = vcmp.ge.f32.partialorder %v993_v63, 0.0  ;;  %v1008_v14 = vmul.f32 %v1004_v12, %v994_v10 }
 0x3c3   : > { %vm998_vm15 = vcmp.ge.f32.partialorder %v994_v10, 0.0  ;;  %v929_v21 = vmul.f32 %v924_v57, %v2358_v19 }
 0x3c4   : > { %v972_v13 = vadd.f32 %v968_v6, %v930_v61  ;;  %v1011_v23 = vsel %vm997_vm13, %v993_v63, %v1007_v46  ;;  %v1012_v29 = vsel %vm998_vm15, %v994_v10, %v1008_v14 }
 0x3c5   : > { %v933_v32 = vadd.f32 %v929_v21, %v905_v16 }
 0x3c6   : > { %v992_v18 = vadd.f32 %v978_v4, %v972_v13 }
 0x3c8   : > { %vm996_vm14 = vcmp.ge.f32.partialorder %v992_v18, 0.0  ;;  %v1006_v20 = vmul.f32 %v1004_v12, %v992_v18  ;;  %v941_v62 = vpop.permute.xlu1 %940  ;;  %v1071_v61 = vpop.permute.xlu2 %1070 }
 0x3c9   : > { %v951_v58 = vsel %vm944_vm12, %v941_v62, 0.0 }
 0x3ca   : > { %v1010_v25 = vsel %vm996_vm14, %v992_v18, %v1006_v20  ;;  %v971_v26 = vmul.f32 %v966_v27, %v951_v58 }
 0x3cb   : > { %v1014_v49 = vadd.f32 %v1011_v23, %v1010_v25 }
 0x3cc   : > { %v975_v33 = vadd.f32 %v971_v26, %v933_v32  ;;  %v1063_v26 = vpop.permute.xlu0 %1062 }
 0x3cd   : > { %v1015_v5 = vadd.f32 %v1014_v49, %v1012_v29 }
 0x3d0   : > { %v990_v4 = vpop.permute.xlu1 %989 }
 0x3d1   : > { %v995_v22 = vadd.f32 %v990_v4, %v975_v33  ;;  %v1091_v6 = vpop.permute.xlu2 %1090 }
 0x3d3   : > { %vm999_vm1 = vcmp.ge.f32.partialorder %v995_v22, 0.0  ;;  %v1009_v35 = vmul.f32 %v1004_v12, %v995_v22 }
 0x3d5   : > { %v1013_v36 = vsel %vm999_vm1, %v995_v22, %v1009_v35 }
 0x3d6   : > { %v1016_v37 = vadd.f32 %v1015_v5, %v1013_v36 }
 0x3d8   : > { %v1017_v28 = vrot.slane %v1016_v37, 4 }
 0x3d9   : > { %v1067_v10 = vpop.permute.xlu1 %1066 }
 0x3da   : > { %v1018_v38 = vadd.f32 %v1017_v28, %v1016_v37  ;;  %v1059_v20 = vpop.permute.xlu2 %1058  ;;  %v1692_v28 = vld [vmem:[%s2608_s3 + $0x10] sm:$0xff] }
 0x3dc   : > { %v1019_v34 = vrot.slane %v1018_v38, 2 }
 0x3de   : > { %v1020_v39 = vadd.f32 %v1019_v34, %v1018_v38  ;;  %v1693_v38 = vld [vmem:[%s2608_s3 + $0x18] sm:$0xff]  ;;  %v2414_v34 = vld [vmem:[%s2609_s4 + $0x40] sm:$0xff] }
 0x3df   : > { %1221 = vrot.lane.b32.xlu2 %v2414_v34, %s1977_s7  ;;  %1158 = vperm.xlu1 %1867, %v2414_v34  }
 0x3e0   : > { %v1021_v40 = vrot.slane %v1020_v39, 1 }
 0x3e2   : > { %v1022_v41 = vadd.f32 %v1021_v40, %v1020_v39  ;;  %v1087_v62 = vpop.permute.xlu1 %1086 }
 0x3e3   : > { %v1079_v22 = vpop.permute.xlu2 %1078 }
 0x3e4   : > { %v1023_v19 = vmul.f32 %v1022_v41, %v2169_v56  ;;  %v1134_v41 = vpop.permute.xlu0 %1133 }
 0x3e6   : > { %v1026_v57 = vsub.f32 %v1012_v29, %v1023_v19  ;;  %v1024_v27 = vsub.f32 %v1010_v25, %v1023_v19  ;;  %v1025_v42 = vsub.f32 %v1011_v23, %v1023_v19  ;;  %v1027_v43 = vsub.f32 %v1013_v36, %v1023_v19  ;;  %v2422_v19 = vld [vmem:[%s2609_s4 + $0x50] sm:$0xff] }
 0x3e7   : > { %1168 = vperm.xlu0 %1869, %v2422_v19  }
 0x3e8   : > { %v1028_v45 = vmul.f32 %v1024_v27, %v1024_v27  ;;  %v1029_v24 = vmul.f32 %v1025_v42, %v1025_v42  ;;  %v1030_v48 = vmul.f32 %v1026_v57, %v1026_v57  ;;  %v1031_v53 = vmul.f32 %v1027_v43, %v1027_v43 }
 0x3ea   : > { %v1032_v52 = vadd.f32 %v1029_v24, %v1028_v45  ;;  %v1083_v35 = vpop.permute.xlu1 %1082 }
 0x3ec   : > { %v1033_v44 = vadd.f32 %v1032_v52, %v1030_v48  ;;  %v1704_v52 = vld [vmem:[%s2606_s1 + $0x40] sm:$0xff] }
 0x3ee   : > { %v1034_v55 = vadd.f32 %v1033_v44, %v1031_v53  ;;  %v1706_v53 = vld [vmem:[%s2606_s1 + $0x50] sm:$0xff]  ;;  %v1708_v44 = vld [vmem:[%s2607_s2 + $0x40] sm:$0xff] }
 0x3ef   : > { %1875 = vset.pattern.permute.xlu0 %v1980_v11 }
 0x3f0   : > { %v1035_v7 = vrot.slane %v1034_v55, 4 }
 0x3f2   : > { %v1036_v59 = vadd.f32 %v1035_v7, %v1034_v55  ;;  %v1707_v55 = vld [vmem:[%s2606_s1 + $0x58] sm:$0xff]  ;;  %v1710_v7 = vld [vmem:[%s2607_s2 + $0x50] sm:$0xff] }
 0x3f3   : > { %v1130_v45 = vpop.permute.xlu1 %1129 }
 0x3f4   : > { %v1037_v3 = vrot.slane %v1036_v59, 2 }
 0x3f6   : > { %v1038_v1 = vadd.f32 %v1037_v3, %v1036_v59  ;;  %v1709_v59 = vld [vmem:[%s2607_s2 + $0x48] sm:$0xff] }
 0x3f8   : > { %v1039_v60 = vrot.slane %v1038_v1, 1 }
 0x3fa   : > { %v1040_v0 = vadd.f32 %v1039_v60, %v1038_v1  ;;  %v1711_v1 = vld [vmem:[%s2607_s2 + $0x58] sm:$0xff] }
 0x3fc   : > { %v1041_v54 = vmul.f32 %v1040_v0, %v2169_v56 }
 0x3fe   : > { %v1042_v63 = vadd.f32 1e-05, %v1041_v54 }
 0x400   : > { %1907 = vrsqrt.f32 %v1042_v63  ;;  %vm1049_vm4 = vweird.f32 %v1042_v63 }
 0x406   : > { %v1908_v13 = vpop.eup %1907 }
 0x407   : > { %v1044_v12 = vmul.f32 %v1908_v13, %v1042_v63  ;;  %vm1050_vm2 = vweird.f32 %v1908_v13 }
 0x408   : > { %vm1051_vm5 = vmor %vm1049_vm4, %vm1050_vm2 }
 0x409   : > { %v1045_v17 = vmul.f32 %v1908_v13, %v1044_v12 }
 0x40b   : > { %v1046_v46 = vmul.f32 0.5, %v1045_v17 }
 0x40d   : > { %v1047_v18 = vsub.f32 1.5, %v1046_v46 }
 0x40f   : > { %v1048_v14 = vmul.f32 %v1908_v13, %v1047_v18 }
 0x411   : > { %v1052_v16 = vsel %vm1051_vm5, %v1908_v13, %v1048_v14 }
 0x412   : > { %v1056_v58 = vmul.f32 %v1052_v16, %v1027_v43  ;;  %v1055_v23 = vmul.f32 %v1052_v16, %v1026_v57  ;;  %v1053_v25 = vmul.f32 %v1052_v16, %v1024_v27  ;;  %v1054_v21 = vmul.f32 %v1052_v16, %v1025_v42  ;;  %v2427_v57 = vld [vmem:[%s2609_s4 + $0x58] sm:$0xff]  ;;  %v2432_v27 = vld [vmem:[%s2609_s4 + $0x48] sm:$0xff] }
 0x413   : > { %1173 = vperm.xlu1 %1867, %v2427_v57   ;;  %1163 = vperm.xlu2 %1868, %v2432_v27  }
 0x414   : > { %v1076_v49 = vmul.f32 %v1071_v61, %v1056_v58  ;;  %v1075_v29 = vmul.f32 %v1067_v10, %v1055_v23  ;;  %v1074_v32 = vmul.f32 %v1063_v26, %v1054_v21  ;;  %v1073_v33 = vmul.f32 %v1059_v20, %v1053_v25  ;;  %1310 = vperm.xlu0 %1875, %v2427_v57  }
 0x416   : > { %v1096_v5 = vadd.f32 %v1091_v6, %v1076_v49  ;;  %v1095_v4 = vadd.f32 %v1087_v62, %v1075_v29  ;;  %v1094_v36 = vadd.f32 %v1083_v35, %v1074_v32  ;;  %v1093_v37 = vadd.f32 %v1079_v22, %v1073_v33 }
 0x418   : > { %1115 = vmatpush.msra.mxu3 %v1096_v5 }
 0x41a   : > { %1116 = vmatpush.msra.mxu3 %v1095_v4 }
 0x41b   : > { %1871 = vset.pattern.permute.xlu1 %v1979_v8  ;;  %1870 = vset.pattern.permute.xlu2 %v1979_v8 }
 0x41c   : > { %1117 = vmatpush.msra.mxu3 %v1094_v36  ;;  %1282 = vperm.xlu1 %1871, %v2432_v27  }
 0x41d   : > { %1278 = vperm.xlu2 %1870, %v2414_v34   ;;  %1876 = vset.pattern.permute.xlu0 %v1979_v8 }
 0x41e   : > { %1118 = vmatpush.msra.mxu3 %v1093_v37  ;;  %1286 = vperm.xlu0 %1876, %v2422_v19  }
 0x41f   : > { %1702 = vmatmul.msk.f32.vlgmr.msra.gmra.mxu3 %vm643_vm3, %v1692_v28 }
 0x424   : > { %1872 = vset.pattern.permute.xlu1 %v1980_v11 }
 0x425   : > { %1298 = vperm.xlu1 %1872, %v2414_v34   ;;  %1873 = vset.pattern.permute.xlu2 %v1980_v11 }
 0x426   : > { %1364 = vperm.xlu0 %1876, %v1708_v44  }
 0x427   : > { %1703 = vmatmul.msk.f32.gmra.mxu3 %vm643_vm3, %v1693_v38 }
 0x42d   : > { %1874 = vset.pattern.permute.xlu1 %v1979_v8 }
 0x42e   : > { %1290 = vperm.xlu1 %1874, %v2427_v57   ;;  %1880 = vset.pattern.permute.xlu0 %v1978_v2 }
 0x42f   : > { %1347 = vperm.xlu0 %1880, %v1710_v7  }
 0x436   : > { %1877 = vset.pattern.permute.xlu1 %v1978_v2 }
 0x437   : > { %1337 = vperm.xlu1 %1877, %v1708_v44   ;;  %1885 = vset.pattern.permute.xlu0 %v1980_v11 }
 0x438   : > { %1414 = vperm.xlu0 %1885, %v1710_v7  }
 0x439   : > { %v1222_v3 = vpop.permute.xlu2 %1221 }
 0x43a   : > { %1743 = vpush %v1222_v3 }
 0x43f   : > { %1879 = vset.pattern.permute.xlu1 %v1979_v8 }
 0x440   : > { %1368 = vperm.xlu1 %1879, %v1709_v59   ;;  %1889 = vset.pattern.permute.xlu0 %v1982_v15 }
 0x448   : > { %1372 = vperm.xlu1 %1879, %v1710_v7  }
 0x450   : > { %1882 = vset.pattern.permute.xlu1 %v1980_v11 }
 0x451   : > { %1410 = vperm.xlu1 %1882, %v1709_v59   ;;  %v1159_v61 = vpop.permute.xlu1 %1158 }
 0x459   : > { %1883 = vset.pattern.permute.xlu1 %v1978_v2 }
 0x45a   : > { %1352 = vperm.xlu1 %1883, %v1711_v1  }
 0x462   : > { %1887 = vset.pattern.permute.xlu1 %v1982_v15 }
 0x463   : > { %1430 = vperm.xlu1 %1887, %v2414_v34  }
 0x46b   : > { %s1744_s8 = spop %1743 }
 0x46d   : > { %v1164_v60 = vpop.permute.xlu2 %1163 }
 0x477   : > { %v2504_v63 = vpop.permute.xlu2 %1278 }
 0x485   : > { %v1174_v14 = vpop.permute.xlu1 %1173 }
 0x4a2   : > { %v1120_v39 = vpop.f32.mrf.mxu3 }
 0x4a3   : > { %v1126_v42 = vadd.f32 %v1120_v39, %v2278_v31  ;;  %v1453_v31 = vrot.slane %v2414_v34, 1 }
 0x4a5   : > { %v2441_v48 = vadd.f32 %v1130_v45, %v1126_v42  ;;  %1454 = vrot.lane.b32.xlu2 %v1453_v31, %s1977_s7 }
 0x4aa   : > { %v1123_v40 = vpop.f32.mrf.mxu3 }
 0x4ab   : > { %v1127_v43 = vadd.f32 %v1123_v40, %v2276_v30  ;;  %v1705_v30 = vld [vmem:[%s2606_s1 + $0x48] sm:$0xff] }
 0x4ad   : > { %v2439_v24 = vadd.f32 %v1134_v41, %v1127_v43  ;;  %1302 = vperm.xlu2 %1873, %v2432_v27  }
 0x4af   : > { %1202 = vmatpush.msrb.mxu1 %v2439_v24 }
 0x4b1   : > { %1203 = vmatpush.msrb.mxu1 %v2441_v48 }
 0x4b2   : > { %1718 = vmatmul.msk.f32.vlgmr.msrb.gmra.mxu1 %vm261_vm0, %v1704_v52 }
 0x4b5   : > { %1306 = vperm.xlu2 %1873, %v2422_v19  }
 0x4ba   : > { %1719 = vmatmul.msk.f32.gmra.mxu1 %vm261_vm0, %v1705_v30 }
 0x4bd   : > { %1878 = vset.pattern.permute.xlu2 %v1978_v2  ;;  %v1169_v2 = vpop.permute.xlu0 %1168 }
 0x4be   : > { %1342 = vperm.xlu2 %1878, %v1709_v59  }
 0x4c2   : > { %1720 = vmatmul.msk.f32.gmra.mxu1 %vm261_vm0, %v1706_v53 }
 0x4c6   : > { %1881 = vset.pattern.permute.xlu2 %v1980_v11 }
 0x4c7   : > { %1406 = vperm.xlu2 %1881, %v1708_v44  }
 0x4ca   : > { %1721 = vmatmul.msk.f32.gmra.mxu1 %vm261_vm0, %v1707_v55 }
 0x4cf   : > { %1884 = vset.pattern.permute.xlu2 %v1979_v8 }
 0x4d0   : > { %1376 = vperm.xlu2 %1884, %v1711_v1  }
 0x4d8   : > { %1886 = vset.pattern.permute.xlu2 %v1980_v11  ;;  %v1224_v11 = vstv %s1744_s8  ;;  %s1608_s8 = sshll.u32 %s1605_s26, 4  ;;  %s1609_s8 = int_to_ptr.hbm [resolvable:$true] %s1608_s8 }
 0x4d9   : > { %1418 = vperm.xlu2 %1886, %v1711_v1   ;;  %s1927_s22 = sshra.s32 %s1609_s8, 4  ;;  %s1928_s22 = int_to_ptr.hbm [resolvable:$true] %s1927_s22 }
 0x4da   : > { %p1934_p0 = scmp.lt.s32.totalorder %s1928_s22, %s2610_s5 }
 0x4e1   : > { %1888 = vset.pattern.permute.xlu2 %v1982_v15 }
 0x4ff   : > { %v1455_v18 = vpop.permute.xlu2 %1454 }
 0x500   : > { %1745 = vpush %v1455_v18 }
 0x52f   : > { %v1205_v8 = vpop.f32.mrf.mxu1 }
 0x530   : > { %v1206_v10 = vadd.f32 %v1205_v8, %v1159_v61 }
 0x531   : > { %s1746_s11 = spop %1745 }
 0x532   : > { %v1226_v17 = vmul.f32 %v1224_v11, %v1206_v10  ;;  %vm1217_vm6 = vcmp.ge.f32.partialorder %v1206_v10, 0.0 }
 0x534   : > { %v1230_v62 = vsel %vm1217_vm6, %v1206_v10, %v1226_v17 }
 0x537   : > { %v1208_v0 = vpop.f32.mrf.mxu1 }
 0x538   : > { %v1209_v54 = vadd.f32 %v1208_v0, %v1164_v60  ;;  %v1311_v0 = vpop.permute.xlu0 %1310 }
 0x53a   : > { %v1227_v12 = vmul.f32 %v1224_v11, %v1209_v54  ;;  %vm1218_vm0 = vcmp.ge.f32.partialorder %v1209_v54, 0.0 }
 0x53c   : > { %v1231_v15 = vsel %vm1218_vm0, %v1209_v54, %v1227_v12  ;;  %v1303_v54 = vpop.permute.xlu2 %1302 }
 0x53d   : > { %v1234_v23 = vadd.f32 %v1231_v15, %v1230_v62 }
 0x53f   : > { %v1211_v6 = vpop.f32.mrf.mxu1 }
 0x540   : > { %v1212_v13 = vadd.f32 %v1211_v6, %v1169_v2  ;;  %v1283_v2 = vpop.permute.xlu1 %1282 }
 0x542   : > { %v1228_v46 = vmul.f32 %v1224_v11, %v1212_v13  ;;  %vm1219_vm7 = vcmp.ge.f32.partialorder %v1212_v13, 0.0 }
 0x544   : > { %v1232_v16 = vsel %vm1219_vm7, %v1212_v13, %v1228_v46  ;;  %v1287_v46 = vpop.permute.xlu0 %1286 }
 0x545   : > { %v1235_v21 = vadd.f32 %v1234_v23, %v1232_v16 }
 0x547   : > { %v1214_v20 = vpop.f32.mrf.mxu1 }
 0x548   : > { %v1215_v58 = vadd.f32 %v1214_v20, %v1174_v14  ;;  %v1299_v20 = vpop.permute.xlu1 %1298 }
 0x54a   : > { %vm1220_vm8 = vcmp.ge.f32.partialorder %v1215_v58, 0.0  ;;  %v1229_v25 = vmul.f32 %v1224_v11, %v1215_v58 }
 0x54c   : > { %v1233_v26 = vsel %vm1220_vm8, %v1215_v58, %v1229_v25 }
 0x54d   : > { %v1236_v49 = vadd.f32 %v1235_v21, %v1233_v26 }
 0x54f   : > { %v1237_v29 = vrot.slane %v1236_v49, 4 }
 0x551   : > { %v1238_v32 = vadd.f32 %v1237_v29, %v1236_v49 }
 0x553   : > { %v1239_v5 = vrot.slane %v1238_v32, 2 }
 0x555   : > { %v1240_v33 = vadd.f32 %v1239_v5, %v1238_v32 }
 0x557   : > { %v1241_v4 = vrot.slane %v1240_v33, 1 }
 0x559   : > { %v1242_v22 = vadd.f32 %v1241_v4, %v1240_v33 }
 0x55b   : > { %v1243_v35 = vmul.f32 %v1242_v22, %v2169_v56  ;;  %v1365_v22 = vpop.permute.xlu0 %1364 }
 0x55d   : > { %v1245_v36 = vsub.f32 %v1231_v15, %v1243_v35  ;;  %v1244_v37 = vsub.f32 %v1230_v62, %v1243_v35  ;;  %v1246_v28 = vsub.f32 %v1232_v16, %v1243_v35  ;;  %v1247_v38 = vsub.f32 %v1233_v26, %v1243_v35  ;;  %v1307_v62 = vpop.permute.xlu2 %1306 }
 0x55f   : > { %v1248_v39 = vmul.f32 %v1244_v37, %v1244_v37  ;;  %v1249_v40 = vmul.f32 %v1245_v36, %v1245_v36  ;;  %v1250_v41 = vmul.f32 %v1246_v28, %v1246_v28  ;;  %v1251_v43 = vmul.f32 %v1247_v38, %v1247_v38 }
 0x561   : > { %v1252_v42 = vadd.f32 %v1249_v40, %v1248_v39  ;;  %v1395_v39 = vadd.s32 4, %v2215_v9 }
 0x563   : > { %v1253_v45 = vadd.f32 %v1252_v42, %v1250_v41  ;;  %vm1397_vm13 = vcmp.lt.s32.totalorder %v1395_v39, 128 }
 0x565   : > { %v1254_v52 = vadd.f32 %v1253_v45, %v1251_v43  ;;  %v1343_v49 = vpop.permute.xlu2 %1342 }
 0x567   : > { %v1255_v30 = vrot.slane %v1254_v52, 4 }
 0x569   : > { %v1256_v31 = vadd.f32 %v1255_v30, %v1254_v52 }
 0x56b   : > { %v1257_v53 = vrot.slane %v1256_v31, 2 }
 0x56d   : > { %v1258_v44 = vadd.f32 %v1257_v53, %v1256_v31  ;;  %v1407_v32 = vpop.permute.xlu2 %1406 }
 0x56f   : > { %v1259_v55 = vrot.slane %v1258_v44, 1 }
 0x571   : > { %v1260_v7 = vadd.f32 %v1259_v55, %v1258_v44 }
 0x573   : > { %v1261_v59 = vmul.f32 %v1260_v7, %v2169_v56 }
 0x575   : > { %v1262_v3 = vadd.f32 1e-05, %v1261_v59 }
 0x577   : > { %1909 = vrsqrt.f32 %v1262_v3  ;;  %vm1269_vm10 = vweird.f32 %v1262_v3 }
 0x57d   : > { %v1910_v1 = vpop.eup %1909 }
 0x57e   : > { %v1264_v8 = vmul.f32 %v1910_v1, %v1262_v3  ;;  %vm1270_vm9 = vweird.f32 %v1910_v1 }
 0x57f   : > { %vm1271_vm11 = vmor %vm1269_vm10, %vm1270_vm9 }
 0x580   : > { %v1265_v60 = vmul.f32 %v1910_v1, %v1264_v8 }
 0x582   : > { %v1266_v61 = vmul.f32 0.5, %v1265_v60 }
 0x584   : > { %v1267_v6 = vsub.f32 1.5, %v1266_v61 }
 0x586   : > { %v1268_v10 = vmul.f32 %v1910_v1, %v1267_v6 }
 0x588   : > { %v1272_v13 = vsel %vm1271_vm11, %v1910_v1, %v1268_v10 }
 0x589   : > { %v1273_v11 = vmul.f32 %v1272_v13, %v1244_v37  ;;  %v1274_v12 = vmul.f32 %v1272_v13, %v1245_v36  ;;  %v1275_v17 = vmul.f32 %v1272_v13, %v1246_v28  ;;  %v1276_v25 = vmul.f32 %v1272_v13, %v1247_v38  ;;  %v1348_v36 = vpop.permute.xlu0 %1347 }
 0x58a   : > { %v1325_v38 = vadd.s32 4294967292, %v2215_v9 }
 0x58b   : > { %v1293_v15 = vmul.f32 %v2504_v63, %v1273_v11  ;;  %v1294_v18 = vmul.f32 %v1283_v2, %v1274_v12  ;;  %v1295_v14 = vmul.f32 %v1287_v46, %v1275_v17  ;;  %v1291_v63 = vpop.permute.xlu1 %1290  ;;  %v1457_v17 = vstv %s1746_s11 }
 0x58c   : > { %v1296_v21 = vmul.f32 %v1291_v63, %v1276_v25  ;;  %vm1326_vm12 = vcmp.ge.s32.totalorder %v1325_v38, 0 }
 0x58d   : > { %v2509_v16 = vadd.f32 %v1303_v54, %v1294_v18  ;;  %v2511_v58 = vadd.f32 %v1299_v20, %v1293_v15  ;;  %v2513_v23 = vadd.f32 %v1307_v62, %v1295_v14 }
 0x58e   : > { %v2521_v26 = vadd.f32 %v1311_v0, %v1296_v21 }
 0x58f   : > { %1391 = vrot.lane.b32.xlu0 %v2513_v23, %s1990_s9  ;;  %1319 = vrot.lane.b32.xlu2 %v2509_v16, %s1991_s10  ;;  %v1379_v3 = vmul.f32 %v1365_v22, %v2511_v58 }
 0x590   : > { %1317 = vrot.lane.b32.xlu1 %v2511_v58, %s1991_s10 }
 0x593   : > { %v1338_v29 = vpop.permute.xlu1 %1337 }
 0x597   : > { %1438 = vperm.xlu0 %1889, %v2422_v19   ;;  %1321 = vrot.lane.b32.xlu2 %v2513_v23, %s1991_s10 }
 0x598   : > { %1387 = vrot.lane.b32.xlu1 %v2511_v58, %s1990_s9 }
 0x59b   : > { %v1369_v5 = vpop.permute.xlu1 %1368 }
 0x59c   : > { %v1380_v31 = vmul.f32 %v1369_v5, %v2509_v16 }
 0x59f   : > { %1893 = vset.pattern.permute.xlu0 %v1985_v50  ;;  %1389 = vrot.lane.b32.xlu2 %v2509_v16, %s1990_s9 }
 0x5a0   : > { %1393 = vrot.lane.b32.xlu1 %v2521_v26, %s1990_s9  ;;  %1515 = vperm.xlu0 %1893, %v2432_v27   ;;  %s1594_s9 = scalar_lea.sflag [#allocation3], %s215_s15 }
 0x5a3   : > { %v1373_v33 = vpop.permute.xlu1 %1372 }
 0x5a4   : > { %v1381_v44 = vmul.f32 %v1373_v33, %v2513_v23 }
 0x5a7   : > { %1323 = vrot.lane.b32.xlu2 %v2521_v26, %s1991_s10  ;;  %s1929_s10 = scalar_lea.hbm %s1928_s22, 16 }
 0x5a8   : > { %1442 = vperm.xlu1 %1887, %v2427_v57   ;;  %1897 = vset.pattern.permute.xlu0 %v1987_v47  ;;  %p1930_p11 = scmp.ne.s32.totalorder %s1928_s22, %s1929_s10  ;;  %p1935_p1 = scmp.lt.s32.totalorder %s1933_s13, %s1929_s10 }
 0x5a9   : > { %1582 = vperm.xlu0 %1897, %v2414_v34  }
 0x5aa   : > { %p1931_p12 = pnand %p1930_p11, %p2062_p5  ;;  %p1936_p2 = por %p1935_p1, %p1934_p0 }
 0x5ac   : > { %p1932_p13 = pneg %p1931_p12 }
 0x5ae   : > { %p1937_p3 = pnand %p1936_p2, %p1932_p13 }
 0x5af   : > { %1434 = vperm.xlu2 %1888, %v2432_v27  }
 0x5b0   : > { %1891 = vset.pattern.permute.xlu1 %v1985_v50 }
 0x5b1   : > { %1519 = vperm.xlu1 %1891, %v2422_v19  }
 0x5b7   : > { %1890 = vset.pattern.permute.xlu2 %v1985_v50 }
 0x5b8   : > { %1523 = vperm.xlu2 %1890, %v2427_v57  }
 0x5b9   : > { %1894 = vset.pattern.permute.xlu1 %v1986_v51 }
 0x5ba   : > { %1539 = vperm.xlu1 %1894, %v2422_v19   ;;  %v1377_v19 = vpop.permute.xlu2 %1376 }
 0x5bb   : > { %v1382_v63 = vmul.f32 %v1377_v19, %v2521_v26 }
 0x5c0   : > { %1892 = vset.pattern.permute.xlu2 %v1986_v51 }
 0x5c1   : > { %1543 = vperm.xlu2 %1892, %v2427_v57   ;;  %v1411_v57 = vpop.permute.xlu1 %1410 }
 0x5c2   : > { %1535 = vperm.xlu1 %1894, %v2432_v27   ;;  %v1419_v4 = vpop.permute.xlu2 %1418 }
 0x5c9   : > { %1895 = vset.pattern.permute.xlu2 %v1985_v50  ;;  %v1353_v50 = vpop.permute.xlu1 %1352 }
 0x5ca   : > { %1898 = vset.pattern.permute.xlu1 %v1987_v47  ;;  %1511 = vperm.xlu2 %1895, %v2414_v34   ;;  %v1415_v47 = vpop.permute.xlu0 %1414 }
 0x5cb   : > { %1586 = vperm.xlu1 %1898, %v2432_v27  }
 0x5d1   : > { %v1431_v28 = vpop.permute.xlu1 %1430 }
 0x5d2   : > { %1896 = vset.pattern.permute.xlu2 %v1986_v51 }
 0x5d3   : > { %1531 = vperm.xlu2 %1896, %v2414_v34  }
 0x5e9   : > { %v1320_v35 = vpop.permute.xlu2 %1319 }
 0x5ea   : > { %v1332_v51 = vsel %vm1326_vm12, %v1320_v35, 0.0 }
 0x5eb   : > { %v1356_v45 = vmul.f32 %v1343_v49, %v1332_v51 }
 0x5ed   : > { %v1384_v55 = vadd.f32 %v1380_v31, %v1356_v45 }
 0x5f1   : > { %v1322_v37 = vpop.permute.xlu2 %1321 }
 0x5f2   : > { %v1333_v42 = vsel %vm1326_vm12, %v1322_v37, 0.0 }
 0x5f3   : > { %v1357_v53 = vmul.f32 %v1348_v36, %v1333_v42 }
 0x5f5   : > { %v1385_v1 = vadd.f32 %v1381_v44, %v1357_v53 }
 0x5f9   : > { %v1390_v27 = vpop.permute.xlu2 %1389 }
 0x5fa   : > { %v1402_v43 = vsel %vm1397_vm13, %v1390_v27, 0.0 }
 0x5fb   : > { %v1422_v9 = vmul.f32 %v1411_v57, %v1402_v43 }
 0x5fd   : > { %v1426_v60 = vadd.f32 %v1422_v9, %v1384_v55 }
 0x601   : > { %v1392_v34 = vpop.permute.xlu0 %1391  ;;  %v1324_v40 = vpop.permute.xlu2 %1323 }
 0x602   : > { %v1318_v41 = vpop.permute.xlu1 %1317  ;;  %v1403_v52 = vsel %vm1397_vm13, %v1392_v34, 0.0  ;;  %v1334_v46 = vsel %vm1326_vm12, %v1324_v40, 0.0 }
 0x603   : > { %v1331_v30 = vsel %vm1326_vm12, %v1318_v41, 0.0  ;;  %v1423_v7 = vmul.f32 %v1415_v47, %v1403_v52  ;;  %v1358_v16 = vmul.f32 %v1353_v50, %v1334_v46 }
 0x604   : > { %v1355_v59 = vmul.f32 %v1338_v29, %v1331_v30 }
 0x605   : > { %v1427_v6 = vadd.f32 %v1423_v7, %v1385_v1 }
 0x606   : > { %v1383_v54 = vadd.f32 %v1379_v3, %v1355_v59 }
 0x609   : > { %v1435_v8 = vpop.permute.xlu2 %1434  ;;  %v1439_v61 = vpop.permute.xlu0 %1438 }
 0x60a   : > { %v1388_v0 = vpop.permute.xlu1 %1387  ;;  %v1446_v10 = vadd.f32 %v1435_v8, %v1426_v60  ;;  %v1447_v11 = vadd.f32 %v1439_v61, %v1427_v6 }
 0x60b   : > { %v1401_v2 = vsel %vm1397_vm13, %v1388_v0, 0.0 }
 0x60c   : > { %v1421_v13 = vmul.f32 %v1407_v32, %v1401_v2  ;;  %v1460_v15 = vmul.f32 %v1457_v17, %v1446_v10  ;;  %vm1450_vm14 = vcmp.ge.f32.partialorder %v1446_v10, 0.0  ;;  %v1461_v14 = vmul.f32 %v1457_v17, %v1447_v11 }
 0x60d   : > { %vm1451_vm1 = vcmp.ge.f32.partialorder %v1447_v11, 0.0  ;;  %v1386_v32 = vadd.f32 %v1382_v63, %v1358_v16 }
 0x60e   : > { %v1425_v12 = vadd.f32 %v1421_v13, %v1383_v54  ;;  %v1464_v23 = vsel %vm1450_vm14, %v1446_v10, %v1460_v15  ;;  %v1465_v29 = vsel %vm1451_vm1, %v1447_v11, %v1461_v14 }
 0x610   : > { %v1445_v18 = vadd.f32 %v1431_v28, %v1425_v12 }
 0x612   : > { %vm1449_vm15 = vcmp.ge.f32.partialorder %v1445_v18, 0.0  ;;  %v1459_v20 = vmul.f32 %v1457_v17, %v1445_v18  ;;  %v1394_v62 = vpop.permute.xlu1 %1393  ;;  %v1524_v59 = vpop.permute.xlu2 %1523 }
 0x613   : > { %v1404_v58 = vsel %vm1397_vm13, %v1394_v62, 0.0 }
 0x614   : > { %v1463_v25 = vsel %vm1449_vm15, %v1445_v18, %v1459_v20  ;;  %v1424_v21 = vmul.f32 %v1419_v4, %v1404_v58  ;;  %v1516_v18 = vpop.permute.xlu0 %1515 }
 0x615   : > { %v1467_v49 = vadd.f32 %v1464_v23, %v1463_v25 }
 0x616   : > { %v1428_v33 = vadd.f32 %v1424_v21, %v1386_v32  ;;  %v1713_v32 = vld [vmem:[%s2608_s3 + $0x28] sm:$0xff] }
 0x617   : > { %v1468_v5 = vadd.f32 %v1467_v49, %v1465_v29 }
 0x61a   : > { %v1443_v57 = vpop.permute.xlu1 %1442 }
 0x61b   : > { %v1448_v22 = vadd.f32 %v1443_v57, %v1428_v33  ;;  %v1544_v8 = vpop.permute.xlu2 %1543 }
 0x61c   : > { %v1583_v33 = vpop.permute.xlu0 %1582 }
 0x61d   : > { %vm1452_vm2 = vcmp.ge.f32.partialorder %v1448_v22, 0.0  ;;  %v1462_v35 = vmul.f32 %v1457_v17, %v1448_v22 }
 0x61f   : > { %v1466_v36 = vsel %vm1452_vm2, %v1448_v22, %v1462_v35 }
 0x620   : > { %v1469_v37 = vadd.f32 %v1468_v5, %v1466_v36 }
 0x622   : > { %v1470_v50 = vrot.slane %v1469_v37, 4 }
 0x623   : > { %v1520_v60 = vpop.permute.xlu1 %1519 }
 0x624   : > { %v1471_v47 = vadd.f32 %v1470_v50, %v1469_v37  ;;  %v1512_v13 = vpop.permute.xlu2 %1511 }
 0x626   : > { %v1472_v28 = vrot.slane %v1471_v47, 2 }
 0x628   : > { %v1473_v38 = vadd.f32 %v1472_v28, %v1471_v47 }
 0x62a   : > { %v1474_v27 = vrot.slane %v1473_v38, 1 }
 0x62c   : > { %v1475_v39 = vadd.f32 %v1474_v27, %v1473_v38  ;;  %v1540_v11 = vpop.permute.xlu1 %1539 }
 0x62e   : > { %v1476_v26 = vmul.f32 %v1475_v39, %v2169_v56 }
 0x630   : > { %v1477_v19 = vsub.f32 %v1463_v25, %v1476_v26  ;;  %v1478_v4 = vsub.f32 %v1464_v23, %v1476_v26  ;;  %v1479_v51 = vsub.f32 %v1465_v29, %v1476_v26  ;;  %v1480_v34 = vsub.f32 %v1466_v36, %v1476_v26  ;;  %v1532_v25 = vpop.permute.xlu2 %1531  ;;  %v1712_v29 = vld [vmem:[%s2608_s3 + $0x20] sm:$0xff] }
 0x632   : > { %v1481_v40 = vmul.f32 %v1477_v19, %v1477_v19  ;;  %v1482_v41 = vmul.f32 %v1478_v4, %v1478_v4  ;;  %v1483_v42 = vmul.f32 %v1479_v51, %v1479_v51  ;;  %v1484_v45 = vmul.f32 %v1480_v34, %v1480_v34 }
 0x634   : > { %v1485_v43 = vadd.f32 %v1482_v41, %v1481_v40  ;;  %v1536_v63 = vpop.permute.xlu1 %1535 }
 0x636   : > { %v1486_v52 = vadd.f32 %v1485_v43, %v1483_v42 }
 0x638   : > { %v1487_v30 = vadd.f32 %v1486_v52, %v1484_v45 }
 0x63a   : > { %v1488_v31 = vrot.slane %v1487_v30, 4 }
 0x63c   : > { %v1489_v53 = vadd.f32 %v1488_v31, %v1487_v30 }
 0x63d   : > { %v1587_v36 = vpop.permute.xlu1 %1586 }
 0x63e   : > { %v1490_v9 = vrot.slane %v1489_v53, 2 }
 0x640   : > { %v1491_v44 = vadd.f32 %v1490_v9, %v1489_v53 }
 0x642   : > { %v1492_v55 = vrot.slane %v1491_v44, 1 }
 0x644   : > { %v1493_v7 = vadd.f32 %v1492_v55, %v1491_v44 }
 0x646   : > { %v1494_v3 = vmul.f32 %v1493_v7, %v2169_v56 }
 0x648   : > { %v1495_v1 = vadd.f32 1e-05, %v1494_v3 }
 0x64a   : > { %1911 = vrsqrt.f32 %v1495_v1  ;;  %vm1502_vm5 = vweird.f32 %v1495_v1 }
 0x650   : > { %v1912_v0 = vpop.eup %1911 }
 0x651   : > { %v1497_v61 = vmul.f32 %v1912_v0, %v1495_v1  ;;  %vm1503_vm4 = vweird.f32 %v1912_v0 }
 0x652   : > { %vm1504_vm0 = vmor %vm1502_vm5, %vm1503_vm4 }
 0x653   : > { %v1498_v2 = vmul.f32 %v1912_v0, %v1497_v61 }
 0x655   : > { %v1499_v54 = vmul.f32 0.5, %v1498_v2 }
 0x657   : > { %v1500_v6 = vsub.f32 1.5, %v1499_v54 }
 0x659   : > { %v1501_v10 = vmul.f32 %v1912_v0, %v1500_v6 }
 0x65b   : > { %v1505_v12 = vsel %vm1504_vm0, %v1912_v0, %v1501_v10 }
 0x65c   : > { %v1509_v17 = vmul.f32 %v1505_v12, %v1480_v34  ;;  %v1508_v46 = vmul.f32 %v1505_v12, %v1479_v51  ;;  %v1506_v15 = vmul.f32 %v1505_v12, %v1477_v19  ;;  %v1507_v56 = vmul.f32 %v1505_v12, %v1478_v4 }
 0x65e   : > { %v1529_v14 = vmul.f32 %v1524_v59, %v1509_v17  ;;  %v1528_v20 = vmul.f32 %v1520_v60, %v1508_v46  ;;  %v1527_v16 = vmul.f32 %v1516_v18, %v1507_v56  ;;  %v1526_v58 = vmul.f32 %v1512_v13, %v1506_v15 }
 0x660   : > { %v1549_v62 = vadd.f32 %v1544_v8, %v1529_v14  ;;  %v1548_v23 = vadd.f32 %v1540_v11, %v1528_v20  ;;  %v1547_v21 = vadd.f32 %v1536_v63, %v1527_v16  ;;  %v1546_v49 = vadd.f32 %v1532_v25, %v1526_v58 }
 0x662   : > { %1568 = vmatpush.msrb.mxu3 %v1549_v62 }
 0x664   : > { %1569 = vmatpush.msrb.mxu3 %v1548_v23 }
 0x666   : > { %1570 = vmatpush.msrb.mxu3 %v1547_v21 }
 0x668   : > { %1571 = vmatpush.msrb.mxu3 %v1546_v49 }
 0x669   : > { %1722 = vmatmul.msk.f32.vlgmr.msrb.gmra.mxu3 %vm643_vm3, %v1712_v29 }
 0x671   : > { %1723 = vmatmul.msk.f32.gmra.mxu3 %vm643_vm3, %v1713_v32 }
 0x6ec   : > { %v1573_v5 = vpop.f32.mrf.mxu3 }
 0x6ed   : > { %v1579_v57 = vadd.f32 %v1573_v5, %v2441_v48 }
 0x6ef   : > { %v1589_v22 = vadd.f32 %v1583_v33, %v1579_v57 }
 0x6f1   : > { %1591 = vst [vmem:[%s217_s30] sm:$0xff] %v1589_v22 }
 0x6f4   : > { %v1576_v35 = vpop.f32.mrf.mxu3 }
 0x6f5   : > { %v1580_v37 = vadd.f32 %v1576_v35, %v2439_v24 }
 0x6f7   : > { %v1590_v50 = vadd.f32 %v1587_v36, %v1580_v37 }
 0x6f9   : > { %1592 = vst [vmem:[%s217_s30 + $0x8] sm:$0xff] %v1590_v50 }
 0x6fa   : > { %1940 = shalt.err (!%p1937_p3)
}
 0x6fb   : > { %s1992_s15 = smov 128   ;;  %s1993_s16 = smov 8  }
 0x6fc   : > { %1747 = dma.vmem_to_hbm [thread:$0]  (%p2062_p5), %s1607_s6, 256, %s1609_s8, %s1594_s9, %s1992_s15, %s1992_s15, %s1993_s16  }
 0x6fd PF: > { %p1753_p4 = scmp.ge.s32.totalorder %s1975_s21, 2  ;;  %s1623_s17 = sand.u32 1, %s1963_s18  }
 0x6fe   : > { %s1624_s23 = scalar_lea.sflag [#allocation3], %s1623_s17 }
 0x6ff   : > { %p1750_p7 = pnand %p1753_p4, %p2066_p6 }
 0x701   : > { %p1751_p8 = pneg %p1750_p7 }
 0x703   : > { %1958 = dma.done.wait (%p1751_p8), %s1624_s23, 256  }
 0x704   : > { %1960 = vsyncadd (%p1751_p8), %s1624_s23, 4294967040  ;;  %p15_p9 = scmp.ge.s32.totalorder %s2049_s24, 4   ;;  %s2613_s18 = smov %s1967_s19 }
 0x705   : > { %s2614_s19 = smov %s1971_s20  ;;  %s2615_s20 = smov %s2060_s27 }
 0x706   : > { %s2616_s21 = smov %s2049_s24  ;;  %17 = sbr.rel (!%p15_p9) target bundleno = 3 (0x3), region = 83 }
 0x70b   :  { %1630 = vsyncpa [#allocation3], 1 }
 0x70c   :  { %1632 = vsyncpa [#allocation3 + $0x1], 1 }

</bundles_post_ra>
